<compile_context>
chip_gen: v7x
topology: tpu7x:2x2x1
jax: 0.10.0
libtpu: 0.0.40
codegen_flags: <defaults>
</compile_context>

<pallas_src>
import math
from functools import partial

import numpy as np
import jax
import jax.numpy as jnp
from jax import lax
from jax.experimental import pallas as pl
from jax.experimental.pallas import tpu as pltpu

# ---- "config" (deterministic, in-script) -----------------------------------
HIDDEN = 32                      # config.hidden_size
NUM_HEADS = 4                    # config.num_attention_heads
HEAD_DIM = HIDDEN // NUM_HEADS   # 8
ATTENTION_DROPOUT = 0.0          # config.attention_dropout; dropout is identity (p=0 / eval)


# ---------------- host-side static preparation (glue) -------------------------

def get_sparse_indices(seq_length, sparsity_factor):
    idx = []
    for i in range(seq_length):
        start = max(0, i - sparsity_factor)
        end = min(seq_length, i + sparsity_factor + 1)
        idx.extend([(i, j) for j in range(start, end)])
    return np.asarray(idx, dtype=np.int32)


def _round_up(n, m):
    return ((n + m - 1) // m) * m


def _selection_matrices(indices, seq_len):
    """One-hot (P_pad, L) f32 gather matrices.  The indices are static at trace time,
    so the sparse gather becomes an in-kernel MXU matmul (no expanded HBM copies).
    P is padded up to a multiple of 8 so the score/output tiles are sublane-aligned."""
    indices = np.asarray(indices)
    P = int(indices.shape[0])
    P_pad = _round_up(max(P, 8), 8)
    sq = np.zeros((P_pad, seq_len), np.float32)
    sk = np.zeros((P_pad, seq_len), np.float32)
    sq[np.arange(P), indices[:, 0]] = 1.0
    sk[np.arange(P), indices[:, 1]] = 1.0
    return jnp.asarray(sq), jnp.asarray(sk), P, P_pad


def prepare_params(params):
    """One-time weight packing: fused pre-transposed QKV weight and transposed output
    projection (removes the per-call host-side jnp.transpose of the old version)."""
    wqkv_t = jnp.transpose(
        jnp.concatenate([params["wq"], params["wk"], params["wv"]], axis=0))  # (HIDDEN, 3*HIDDEN)
    wo_t = jnp.transpose(params["wo"])                                        # (HIDDEN, HIDDEN)
    return {"wqkv_t": wqkv_t, "wo_t": wo_t}


# ---------------- in-kernel multi-head pair attention --------------------------

def _attend_heads(qs, ks, vs, *, P, H, D, scale):
    """qs/ks/vs: (P_pad, H*D) f32 gathered pair tensors.  Returns a list of H
    per-head (P_pad, D) attention outputs.  Faithfully mirrors the reference:
    every (query,key) pair attends over ALL P pairs (full PxP softmax); padded
    key columns (p >= P) are masked out with a -1e30 additive bias."""
    P_pad = qs.shape[0]
    if P_pad > P:
        col = lax.broadcasted_iota(jnp.int32, (P_pad, P_pad), 1)
        bias = jnp.where(col < P, 0.0, -1e30).astype(jnp.float32)
    else:
        bias = None

    outs = []
    for h in range(H):
        sl = slice(h * D, (h + 1) * D)
        qh = qs[:, sl] * scale          # pre-scale q: P_pad*D muls instead of P_pad^2
        kh = ks[:, sl]
        vh = vs[:, sl]
        # scores = qh @ kh^T  (contract on D; MXU consumes the transposed RHS directly)
        s = lax.dot_general(qh, kh, (((1,), (1,)), ((), ())),
                            preferred_element_type=jnp.float32)      # (P_pad, P_pad)
        if bias is not None:
            s = s + bias
        m = jnp.max(s, axis=-1, keepdims=True)
        e = jnp.exp(s - m)
        denom = jnp.sum(e, axis=-1, keepdims=True)
        p = e * pl.reciprocal(denom, approx=True)                    # softmax(dim=-1) on EUP
        # dropout(p) with p=0 / eval mode is identity.
        outs.append(jnp.dot(p, vh, preferred_element_type=jnp.float32))  # (P_pad, D)
    return outs


# ---------------- Pallas kernels ------------------------------------------------

def _fused_forward_kernel(x_ref, wqkv_ref, wo_ref, sq_ref, sk_ref, o_ref,
                          *, L, P, H, D, scale):
    """One batch row: x (L, HID) -> QKV proj -> sparse gather -> attention -> out proj."""
    HID = H * D
    x = x_ref[...]                                                       # (L, HID)
    qkv = jnp.dot(x, wqkv_ref[...], preferred_element_type=jnp.float32)  # (L, 3*HID)
    q = qkv[:, 0:HID]
    k = qkv[:, HID:2 * HID]
    v = qkv[:, 2 * HID:3 * HID]

    # in-kernel sparse gather (static indices baked into one-hot matrices)
    qs = jnp.dot(sq_ref[...], q, preferred_element_type=jnp.float32)     # (P_pad, HID)
    ks = jnp.dot(sk_ref[...], k, preferred_element_type=jnp.float32)
    vs = jnp.dot(sk_ref[...], v, preferred_element_type=jnp.float32)

    heads = _attend_heads(qs, ks, vs, P=P, H=H, D=D, scale=scale)

    # attention_output.transpose(1,2).view(L, HID) @ wo^T, fused per head:
    #   concat_h(o_h) @ wo_t == sum_h o_h @ wo_t[h*D:(h+1)*D, :]
    out = jnp.zeros((L, HID), jnp.float32)
    for h in range(H):
        out = out + jnp.dot(heads[h][:L, :], wo_ref[h * D:(h + 1) * D, :],
                            preferred_element_type=jnp.float32)
    o_ref[...] = out.astype(o_ref.dtype)


def _sparse_core_kernel(q_ref, k_ref, v_ref, sq_ref, sk_ref, o_ref, *, P, H, D, scale):
    """Mirrors _sparse_attention for one batch row with lane-dense (P_pad, H*D) output."""
    qs = jnp.dot(sq_ref[...], q_ref[...], preferred_element_type=jnp.float32)  # (P_pad, HID)
    ks = jnp.dot(sk_ref[...], k_ref[...], preferred_element_type=jnp.float32)
    vs = jnp.dot(sk_ref[...], v_ref[...], preferred_element_type=jnp.float32)
    heads = _attend_heads(qs, ks, vs, P=P, H=H, D=D, scale=scale)
    for h in range(H):
        o_ref[:, h * D:(h + 1) * D] = heads[h].astype(o_ref.dtype)


# ---------------- module forward / attention core wrappers ----------------------

def sparse_attention_forward(prepped, hidden_states, sparsity_factor):
    """Mirrors SparseAttention.forward (use_cache=False, output_attentions=False),
    fully fused into a single pallas_call (grid = batch, parallel)."""
    B, L, HID = hidden_states.shape
    H = NUM_HEADS
    D = HID // H
    idx = get_sparse_indices(L, sparsity_factor)
    sq, sk, P, P_pad = _selection_matrices(idx, L)
    # TODO(synk): the reference's `.view(B, H, seq_length, head_dim)` is only
    # shape-consistent when P == seq_length (sparsity_factor == 0 or seq_length == 1);
    # PyTorch itself raises a RuntimeError otherwise, so we only take this path then.
    assert P == L, "reference forward is shape-inconsistent unless P == seq_length"

    kernel = partial(_fused_forward_kernel, L=L, P=P, H=H, D=D,
                     scale=1.0 / math.sqrt(D))
    out = pl.pallas_call(
        kernel,
        out_shape=jax.ShapeDtypeStruct((B, L, HID), jnp.float32),
        grid=(B,),
        in_specs=[
            pl.BlockSpec((None, L, HID), lambda b: (b, 0, 0)),     # x, per-batch row
            pl.BlockSpec((HID, 3 * HID), lambda b: (0, 0)),        # fused Wqkv^T
            pl.BlockSpec((HID, HID), lambda b: (0, 0)),            # Wo^T
            pl.BlockSpec((P_pad, L), lambda b: (0, 0)),            # query gather one-hot
            pl.BlockSpec((P_pad, L), lambda b: (0, 0)),            # key/value gather one-hot
        ],
        out_specs=pl.BlockSpec((None, L, HID), lambda b: (b, 0, 0)),
        compiler_params=pltpu.CompilerParams(
            dimension_semantics=("parallel",)),                    # v7x: both TCs get a batch row
    )(hidden_states, prepped["wqkv_t"], prepped["wo_t"], sq, sk)
    return out, None   # (attention_output, past_key_value=None)


def sparse_attention_core(q, k, v, indices):
    """q, k, v: (B, H, L, D).  indices: (P, 2) int array of (query_pos, key_pos) pairs.
    Returns (B, H, P, D) == torch.matmul(softmax(Qs Ks^T / sqrt(D)), Vs)."""
    B, H, L, D = q.shape
    HID = H * D
    # wrapper-side layout plumbing: (B, H, L, D) -> lane-dense (B, L, H*D)
    qf = jnp.transpose(q, (0, 2, 1, 3)).reshape(B, L, HID)
    kf = jnp.transpose(k, (0, 2, 1, 3)).reshape(B, L, HID)
    vf = jnp.transpose(v, (0, 2, 1, 3)).reshape(B, L, HID)
    sq, sk, P, P_pad = _selection_matrices(indices, L)

    kernel = partial(_sparse_core_kernel, P=P, H=H, D=D, scale=1.0 / math.sqrt(D))
    out = pl.pallas_call(
        kernel,
        out_shape=jax.ShapeDtypeStruct((B, P_pad, HID), jnp.float32),
        grid=(B,),
        in_specs=[
            pl.BlockSpec((None, L, HID), lambda b: (b, 0, 0)),
            pl.BlockSpec((None, L, HID), lambda b: (b, 0, 0)),
            pl.BlockSpec((None, L, HID), lambda b: (b, 0, 0)),
            pl.BlockSpec((P_pad, L), lambda b: (0, 0)),
            pl.BlockSpec((P_pad, L), lambda b: (0, 0)),
        ],
        out_specs=pl.BlockSpec((None, P_pad, HID), lambda b: (b, 0, 0)),
        compiler_params=pltpu.CompilerParams(
            dimension_semantics=("parallel",)),
    )(qf, kf, vf, sq, sk)
    # wrapper-side layout plumbing back to the reference (B, H, P, D) shape
    out = out[:, :P, :].reshape(B, P, H, D)
    return jnp.transpose(out, (0, 2, 1, 3))


# ---------------- pure-JAX references (for correctness check) -------------------

def _project_ref(x, w, B, L):
    return (x.reshape(B * L, HIDDEN) @ w.T).reshape(B, L, NUM_HEADS, HEAD_DIM).transpose(0, 2, 1, 3)


def _core_ref(q, k, v, indices):
    qi, ki = indices[:, 0], indices[:, 1]
    qs, ks, vs = q[:, :, qi, :], k[:, :, ki, :], v[:, :, ki, :]
    s = jnp.einsum("bhpd,bhqd->bhpq", qs, ks) / math.sqrt(q.shape[-1])
    p = jax.nn.softmax(s, axis=-1)
    return jnp.einsum("bhpq,bhqd->bhpd", p, vs)


def _forward_ref(params, x, sparsity_factor):
    B, L, Hsz = x.shape
    q = _project_ref(x, params["wq"], B, L)
    k = _project_ref(x, params["wk"], B, L)
    v = _project_ref(x, params["wv"], B, L)
    attn = _core_ref(q, k, v, get_sparse_indices(L, sparsity_factor))
    out = attn.transpose(0, 2, 1, 3).reshape(B * L, Hsz) @ params["wo"].T
    return out.reshape(B, L, Hsz)


# ---------------- main -----------------------------------------------------------

if __name__ == "__main__":
    key = jax.random.PRNGKey(0)
    kx, kq, kk, kv, ko = jax.random.split(key, 5)
    B, L = 2, 8

    params = {
        "wq": 0.02 * jax.random.normal(kq, (HIDDEN, HIDDEN), jnp.float32),
        "wk": 0.02 * jax.random.normal(kk, (HIDDEN, HIDDEN), jnp.float32),
        "wv": 0.02 * jax.random.normal(kv, (HIDDEN, HIDDEN), jnp.float32),
        "wo": 0.02 * jax.random.normal(ko, (HIDDEN, HIDDEN), jnp.float32),
    }
    prepped = prepare_params(params)
    x = jax.random.normal(kx, (B, L, HIDDEN), jnp.float32)

    # Tolerances are relaxed slightly vs. 1e-5 because the softmax denominator uses the
    # approximate EUP reciprocal (pl.reciprocal(..., approx=True)).
    RTOL, ATOL = 1e-2, 1e-4

    # (1) Sparse-pair attention core at the module default sparsity_factor=4
    #     (P = 52 (query, key) pairs for L = 8, padded to 56 with masked key columns).
    idx4 = get_sparse_indices(L, 4)
    q = _project_ref(x, params["wq"], B, L)
    k = _project_ref(x, params["wk"], B, L)
    v = _project_ref(x, params["wv"], B, L)
    core_fn = jax.jit(lambda qq, kk_, vv: sparse_attention_core(qq, kk_, vv, idx4))
    attn = jax.block_until_ready(core_fn(q, k, v))
    np.testing.assert_allclose(np.asarray(attn), np.asarray(_core_ref(q, k, v, idx4)),
                               rtol=RTOL, atol=ATOL)

    # (2) Fully fused forward (QKV proj -> gather -> attention -> output proj in ONE
    #     pallas_call).  The reference's final view only holds when P == L, i.e.
    #     sparsity_factor=0.
    fwd_fn = jax.jit(sparse_attention_forward, static_argnums=2)
    out, _ = fwd_fn(prepped, x, 0)
    out = jax.block_until_ready(out)
    np.testing.assert_allclose(np.asarray(out), np.asarray(_forward_ref(params, x, 0)),
                               rtol=RTOL, atol=ATOL)
    assert out.shape == (B, L, HIDDEN)

    print("KERNEL_OK")
</pallas_src>

<mosaic_0001>
module attributes {stable_mosaic.version = 11 : i64} {
  func.func @_sparse_core_kernel(%arg0: i32, %arg1: memref<1x8x32xf32, #tpu.memory_space<vmem>>, %arg2: memref<1x8x32xf32, #tpu.memory_space<vmem>>, %arg3: memref<1x8x32xf32, #tpu.memory_space<vmem>>, %arg4: memref<56x8xf32, #tpu.memory_space<vmem>>, %arg5: memref<56x8xf32, #tpu.memory_space<vmem>>, %arg6: memref<1x56x32xf32, #tpu.memory_space<vmem>>) attributes {dimension_semantics = [#tpu.dimension_semantics<parallel>], iteration_bounds = array<i64: 2>, scalar_prefetch = 0 : i64, scratch_operands = 0 : i64, tpu.core_type = #tpu.core_type<tc>, window_params = [{transform_indices = @transform_0, window_bounds = array<i64: 1, 8, 32>}, {transform_indices = @transform_1, window_bounds = array<i64: 1, 8, 32>}, {transform_indices = @transform_2, window_bounds = array<i64: 1, 8, 32>}, {pipeline_mode = #tpu.pipeline_mode<synchronous>, transform_indices = @transform_3, window_bounds = array<i64: 56, 8>}, {pipeline_mode = #tpu.pipeline_mode<synchronous>, transform_indices = @transform_4, window_bounds = array<i64: 56, 8>}, {transform_indices = @transform_5, window_bounds = array<i64: 1, 56, 32>}]} {
    %c0 = arith.constant 0 : index
    %c0_0 = arith.constant 0 : index
    %0 = vector.load %arg4[%c0, %c0_0] : memref<56x8xf32, #tpu.memory_space<vmem>>, vector<56x8xf32>
    %c0_1 = arith.constant 0 : index
    %c0_2 = arith.constant 0 : index
    %c0_3 = arith.constant 0 : index
    %1 = vector.load %arg1[%c0_1, %c0_2, %c0_3] : memref<1x8x32xf32, #tpu.memory_space<vmem>>, vector<1x8x32xf32>
    %2 = vector.shape_cast %1 : vector<1x8x32xf32> to vector<8x32xf32>
    %cst = arith.constant dense<0.000000e+00> : vector<56x32xf32>
    %3 = tpu.matmul %0, %2, %cst {dimension_numbers = #tpu.dot_dimension_numbers<[1], [0], [0], [1], [0, 0, 1, 1], [], []>} : vector<56x8xf32>, vector<8x32xf32>, vector<56x32xf32> -> vector<56x32xf32>
    %c0_4 = arith.constant 0 : index
    %c0_5 = arith.constant 0 : index
    %4 = vector.load %arg5[%c0_4, %c0_5] : memref<56x8xf32, #tpu.memory_space<vmem>>, vector<56x8xf32>
    %c0_6 = arith.constant 0 : index
    %c0_7 = arith.constant 0 : index
    %c0_8 = arith.constant 0 : index
    %5 = vector.load %arg2[%c0_6, %c0_7, %c0_8] : memref<1x8x32xf32, #tpu.memory_space<vmem>>, vector<1x8x32xf32>
    %6 = vector.shape_cast %5 : vector<1x8x32xf32> to vector<8x32xf32>
    %cst_9 = arith.constant dense<0.000000e+00> : vector<56x32xf32>
    %7 = tpu.matmul %4, %6, %cst_9 {dimension_numbers = #tpu.dot_dimension_numbers<[1], [0], [0], [1], [0, 0, 1, 1], [], []>} : vector<56x8xf32>, vector<8x32xf32>, vector<56x32xf32> -> vector<56x32xf32>
    %c0_10 = arith.constant 0 : index
    %c0_11 = arith.constant 0 : index
    %8 = vector.load %arg5[%c0_10, %c0_11] : memref<56x8xf32, #tpu.memory_space<vmem>>, vector<56x8xf32>
    %c0_12 = arith.constant 0 : index
    %c0_13 = arith.constant 0 : index
    %c0_14 = arith.constant 0 : index
    %9 = vector.load %arg3[%c0_12, %c0_13, %c0_14] : memref<1x8x32xf32, #tpu.memory_space<vmem>>, vector<1x8x32xf32>
    %10 = vector.shape_cast %9 : vector<1x8x32xf32> to vector<8x32xf32>
    %cst_15 = arith.constant dense<0.000000e+00> : vector<56x32xf32>
    %11 = tpu.matmul %8, %10, %cst_15 {dimension_numbers = #tpu.dot_dimension_numbers<[1], [0], [0], [1], [0, 0, 1, 1], [], []>} : vector<56x8xf32>, vector<8x32xf32>, vector<56x32xf32> -> vector<56x32xf32>
    %12 = tpu.iota {dimensions = array<i32: 1>} : vector<56x56xi32>
    %c52_i32 = arith.constant 52 : i32
    %13 = vector.broadcast %c52_i32 : i32 to vector<56x56xi32>
    %14 = arith.cmpi slt, %12, %13 : vector<56x56xi32>
    %cst_16 = arith.constant 0.000000e+00 : f32
    %cst_17 = arith.constant -1.000000e+30 : f32
    %15 = vector.broadcast %cst_16 : f32 to vector<56x56xf32>
    %16 = vector.broadcast %cst_17 : f32 to vector<56x56xf32>
    %17 = arith.select %14, %15, %16 : vector<56x56xi1>, vector<56x56xf32>
    %18 = vector.extract_strided_slice %3 {offsets = [0, 0], sizes = [56, 8], strides = [1, 1]} : vector<56x32xf32> to vector<56x8xf32>
    %cst_18 = arith.constant 0.353553385 : f32
    %19 = vector.broadcast %cst_18 : f32 to vector<56x8xf32>
    %20 = arith.mulf %18, %19 : vector<56x8xf32>
    %21 = vector.extract_strided_slice %7 {offsets = [0, 0], sizes = [56, 8], strides = [1, 1]} : vector<56x32xf32> to vector<56x8xf32>
    %22 = vector.extract_strided_slice %11 {offsets = [0, 0], sizes = [56, 8], strides = [1, 1]} : vector<56x32xf32> to vector<56x8xf32>
    %cst_19 = arith.constant dense<0.000000e+00> : vector<56x56xf32>
    %23 = tpu.matmul %20, %21, %cst_19 {dimension_numbers = #tpu.dot_dimension_numbers<[1], [1], [0], [0], [0, 0, 1, 0], [], []>} : vector<56x8xf32>, vector<56x8xf32>, vector<56x56xf32> -> vector<56x56xf32>
    %24 = arith.addf %23, %17 : vector<56x56xf32>
    %cst_20 = arith.constant dense<0xFF800000> : vector<56xf32>
    %25 = vector.multi_reduction <maximumf>, %24, %cst_20 [1] : vector<56x56xf32> to vector<56xf32>
    %26 = vector.shape_cast %25 : vector<56xf32> to vector<56x1xf32>
    %27 = vector.broadcast %26 : vector<56x1xf32> to vector<56x56xf32>
    %28 = arith.subf %24, %27 : vector<56x56xf32>
    %29 = math.exp %28 : vector<56x56xf32>
    %cst_21 = arith.constant dense<0.000000e+00> : vector<56xf32>
    %30 = vector.multi_reduction <add>, %29, %cst_21 [1] : vector<56x56xf32> to vector<56xf32>
    %31 = vector.shape_cast %30 : vector<56xf32> to vector<56x1xf32>
    %32 = tpu.reciprocal %31 {approx = true} : vector<56x1xf32> -> vector<56x1xf32>
    %33 = vector.broadcast %32 : vector<56x1xf32> to vector<56x56xf32>
    %34 = arith.mulf %29, %33 : vector<56x56xf32>
    %cst_22 = arith.constant dense<0.000000e+00> : vector<56x8xf32>
    %35 = tpu.matmul %34, %22, %cst_22 {dimension_numbers = #tpu.dot_dimension_numbers<[1], [0], [0], [1], [0, 0, 1, 1], [], []>} : vector<56x56xf32>, vector<56x8xf32>, vector<56x8xf32> -> vector<56x8xf32>
    %36 = vector.extract_strided_slice %3 {offsets = [0, 8], sizes = [56, 8], strides = [1, 1]} : vector<56x32xf32> to vector<56x8xf32>
    %cst_23 = arith.constant 0.353553385 : f32
    %37 = vector.broadcast %cst_23 : f32 to vector<56x8xf32>
    %38 = arith.mulf %36, %37 : vector<56x8xf32>
    %39 = vector.extract_strided_slice %7 {offsets = [0, 8], sizes = [56, 8], strides = [1, 1]} : vector<56x32xf32> to vector<56x8xf32>
    %40 = vector.extract_strided_slice %11 {offsets = [0, 8], sizes = [56, 8], strides = [1, 1]} : vector<56x32xf32> to vector<56x8xf32>
    %cst_24 = arith.constant dense<0.000000e+00> : vector<56x56xf32>
    %41 = tpu.matmul %38, %39, %cst_24 {dimension_numbers = #tpu.dot_dimension_numbers<[1], [1], [0], [0], [0, 0, 1, 0], [], []>} : vector<56x8xf32>, vector<56x8xf32>, vector<56x56xf32> -> vector<56x56xf32>
    %42 = arith.addf %41, %17 : vector<56x56xf32>
    %cst_25 = arith.constant dense<0xFF800000> : vector<56xf32>
    %43 = vector.multi_reduction <maximumf>, %42, %cst_25 [1] : vector<56x56xf32> to vector<56xf32>
    %44 = vector.shape_cast %43 : vector<56xf32> to vector<56x1xf32>
    %45 = vector.broadcast %44 : vector<56x1xf32> to vector<56x56xf32>
    %46 = arith.subf %42, %45 : vector<56x56xf32>
    %47 = math.exp %46 : vector<56x56xf32>
    %cst_26 = arith.constant dense<0.000000e+00> : vector<56xf32>
    %48 = vector.multi_reduction <add>, %47, %cst_26 [1] : vector<56x56xf32> to vector<56xf32>
    %49 = vector.shape_cast %48 : vector<56xf32> to vector<56x1xf32>
    %50 = tpu.reciprocal %49 {approx = true} : vector<56x1xf32> -> vector<56x1xf32>
    %51 = vector.broadcast %50 : vector<56x1xf32> to vector<56x56xf32>
    %52 = arith.mulf %47, %51 : vector<56x56xf32>
    %cst_27 = arith.constant dense<0.000000e+00> : vector<56x8xf32>
    %53 = tpu.matmul %52, %40, %cst_27 {dimension_numbers = #tpu.dot_dimension_numbers<[1], [0], [0], [1], [0, 0, 1, 1], [], []>} : vector<56x56xf32>, vector<56x8xf32>, vector<56x8xf32> -> vector<56x8xf32>
    %54 = vector.extract_strided_slice %3 {offsets = [0, 16], sizes = [56, 8], strides = [1, 1]} : vector<56x32xf32> to vector<56x8xf32>
    %cst_28 = arith.constant 0.353553385 : f32
    %55 = vector.broadcast %cst_28 : f32 to vector<56x8xf32>
    %56 = arith.mulf %54, %55 : vector<56x8xf32>
    %57 = vector.extract_strided_slice %7 {offsets = [0, 16], sizes = [56, 8], strides = [1, 1]} : vector<56x32xf32> to vector<56x8xf32>
    %58 = vector.extract_strided_slice %11 {offsets = [0, 16], sizes = [56, 8], strides = [1, 1]} : vector<56x32xf32> to vector<56x8xf32>
    %cst_29 = arith.constant dense<0.000000e+00> : vector<56x56xf32>
    %59 = tpu.matmul %56, %57, %cst_29 {dimension_numbers = #tpu.dot_dimension_numbers<[1], [1], [0], [0], [0, 0, 1, 0], [], []>} : vector<56x8xf32>, vector<56x8xf32>, vector<56x56xf32> -> vector<56x56xf32>
    %60 = arith.addf %59, %17 : vector<56x56xf32>
    %cst_30 = arith.constant dense<0xFF800000> : vector<56xf32>
    %61 = vector.multi_reduction <maximumf>, %60, %cst_30 [1] : vector<56x56xf32> to vector<56xf32>
    %62 = vector.shape_cast %61 : vector<56xf32> to vector<56x1xf32>
    %63 = vector.broadcast %62 : vector<56x1xf32> to vector<56x56xf32>
    %64 = arith.subf %60, %63 : vector<56x56xf32>
    %65 = math.exp %64 : vector<56x56xf32>
    %cst_31 = arith.constant dense<0.000000e+00> : vector<56xf32>
    %66 = vector.multi_reduction <add>, %65, %cst_31 [1] : vector<56x56xf32> to vector<56xf32>
    %67 = vector.shape_cast %66 : vector<56xf32> to vector<56x1xf32>
    %68 = tpu.reciprocal %67 {approx = true} : vector<56x1xf32> -> vector<56x1xf32>
    %69 = vector.broadcast %68 : vector<56x1xf32> to vector<56x56xf32>
    %70 = arith.mulf %65, %69 : vector<56x56xf32>
    %cst_32 = arith.constant dense<0.000000e+00> : vector<56x8xf32>
    %71 = tpu.matmul %70, %58, %cst_32 {dimension_numbers = #tpu.dot_dimension_numbers<[1], [0], [0], [1], [0, 0, 1, 1], [], []>} : vector<56x56xf32>, vector<56x8xf32>, vector<56x8xf32> -> vector<56x8xf32>
    %72 = vector.extract_strided_slice %3 {offsets = [0, 24], sizes = [56, 8], strides = [1, 1]} : vector<56x32xf32> to vector<56x8xf32>
    %cst_33 = arith.constant 0.353553385 : f32
    %73 = vector.broadcast %cst_33 : f32 to vector<56x8xf32>
    %74 = arith.mulf %72, %73 : vector<56x8xf32>
    %75 = vector.extract_strided_slice %7 {offsets = [0, 24], sizes = [56, 8], strides = [1, 1]} : vector<56x32xf32> to vector<56x8xf32>
    %76 = vector.extract_strided_slice %11 {offsets = [0, 24], sizes = [56, 8], strides = [1, 1]} : vector<56x32xf32> to vector<56x8xf32>
    %cst_34 = arith.constant dense<0.000000e+00> : vector<56x56xf32>
    %77 = tpu.matmul %74, %75, %cst_34 {dimension_numbers = #tpu.dot_dimension_numbers<[1], [1], [0], [0], [0, 0, 1, 0], [], []>} : vector<56x8xf32>, vector<56x8xf32>, vector<56x56xf32> -> vector<56x56xf32>
    %78 = arith.addf %77, %17 : vector<56x56xf32>
    %cst_35 = arith.constant dense<0xFF800000> : vector<56xf32>
    %79 = vector.multi_reduction <maximumf>, %78, %cst_35 [1] : vector<56x56xf32> to vector<56xf32>
    %80 = vector.shape_cast %79 : vector<56xf32> to vector<56x1xf32>
    %81 = vector.broadcast %80 : vector<56x1xf32> to vector<56x56xf32>
    %82 = arith.subf %78, %81 : vector<56x56xf32>
    %83 = math.exp %82 : vector<56x56xf32>
    %cst_36 = arith.constant dense<0.000000e+00> : vector<56xf32>
    %84 = vector.multi_reduction <add>, %83, %cst_36 [1] : vector<56x56xf32> to vector<56xf32>
    %85 = vector.shape_cast %84 : vector<56xf32> to vector<56x1xf32>
    %86 = tpu.reciprocal %85 {approx = true} : vector<56x1xf32> -> vector<56x1xf32>
    %87 = vector.broadcast %86 : vector<56x1xf32> to vector<56x56xf32>
    %88 = arith.mulf %83, %87 : vector<56x56xf32>
    %cst_37 = arith.constant dense<0.000000e+00> : vector<56x8xf32>
    %89 = tpu.matmul %88, %76, %cst_37 {dimension_numbers = #tpu.dot_dimension_numbers<[1], [0], [0], [1], [0, 0, 1, 1], [], []>} : vector<56x56xf32>, vector<56x8xf32>, vector<56x8xf32> -> vector<56x8xf32>
    %c0_38 = arith.constant 0 : index
    %c0_39 = arith.constant 0 : index
    %c0_40 = arith.constant 0 : index
    %90 = vector.load %arg6[%c0_38, %c0_39, %c0_40] : memref<1x56x32xf32, #tpu.memory_space<vmem>>, vector<1x56x8xf32>
    %91 = vector.shape_cast %90 : vector<1x56x8xf32> to vector<56x8xf32>
    %92 = vector.shape_cast %35 : vector<56x8xf32> to vector<1x56x8xf32>
    tpu.vector_store %arg6[%c0_38, %c0_39, %c0_40], %92 {strides = array<i32>} : memref<1x56x32xf32, #tpu.memory_space<vmem>>, vector<1x56x8xf32>,
    %c0_41 = arith.constant 0 : index
    %c0_42 = arith.constant 0 : index
    %c8 = arith.constant 8 : index
    %93 = vector.load %arg6[%c0_41, %c0_42, %c8] : memref<1x56x32xf32, #tpu.memory_space<vmem>>, vector<1x56x8xf32>
    %94 = vector.shape_cast %93 : vector<1x56x8xf32> to vector<56x8xf32>
    %95 = vector.shape_cast %53 : vector<56x8xf32> to vector<1x56x8xf32>
    tpu.vector_store %arg6[%c0_41, %c0_42, %c8], %95 {strides = array<i32>} : memref<1x56x32xf32, #tpu.memory_space<vmem>>, vector<1x56x8xf32>,
    %c0_43 = arith.constant 0 : index
    %c0_44 = arith.constant 0 : index
    %c16 = arith.constant 16 : index
    %96 = vector.load %arg6[%c0_43, %c0_44, %c16] : memref<1x56x32xf32, #tpu.memory_space<vmem>>, vector<1x56x8xf32>
    %97 = vector.shape_cast %96 : vector<1x56x8xf32> to vector<56x8xf32>
    %98 = vector.shape_cast %71 : vector<56x8xf32> to vector<1x56x8xf32>
    tpu.vector_store %arg6[%c0_43, %c0_44, %c16], %98 {strides = array<i32>} : memref<1x56x32xf32, #tpu.memory_space<vmem>>, vector<1x56x8xf32>,
    %c0_45 = arith.constant 0 : index
    %c0_46 = arith.constant 0 : index
    %c24 = arith.constant 24 : index
    %99 = vector.load %arg6[%c0_45, %c0_46, %c24] : memref<1x56x32xf32, #tpu.memory_space<vmem>>, vector<1x56x8xf32>
    %100 = vector.shape_cast %99 : vector<1x56x8xf32> to vector<56x8xf32>
    %101 = vector.shape_cast %89 : vector<56x8xf32> to vector<1x56x8xf32>
    tpu.vector_store %arg6[%c0_45, %c0_46, %c24], %101 {strides = array<i32>} : memref<1x56x32xf32, #tpu.memory_space<vmem>>, vector<1x56x8xf32>,
    return
  }
  func.func @transform_0(%arg0: i32) -> (i32, i32, i32) {
    %c0_i32 = arith.constant 0 : i32
    %c0_i32_0 = arith.constant 0 : i32
    %c0_i32_1 = arith.constant 0 : i32
    return %arg0, %c0_i32, %c0_i32_0 : i32, i32, i32
  }
  func.func @transform_1(%arg0: i32) -> (i32, i32, i32) {
    %c0_i32 = arith.constant 0 : i32
    %c0_i32_0 = arith.constant 0 : i32
    %c0_i32_1 = arith.constant 0 : i32
    return %arg0, %c0_i32, %c0_i32_0 : i32, i32, i32
  }
  func.func @transform_2(%arg0: i32) -> (i32, i32, i32) {
    %c0_i32 = arith.constant 0 : i32
    %c0_i32_0 = arith.constant 0 : i32
    %c0_i32_1 = arith.constant 0 : i32
    return %arg0, %c0_i32, %c0_i32_0 : i32, i32, i32
  }
  func.func @transform_3(%arg0: i32) -> (i32, i32) {
    %c0_i32 = arith.constant 0 : i32
    %c0_i32_0 = arith.constant 0 : i32
    %c0_i32_1 = arith.constant 0 : i32
    return %c0_i32, %c0_i32_0 : i32, i32
  }
  func.func @transform_4(%arg0: i32) -> (i32, i32) {
    %c0_i32 = arith.constant 0 : i32
    %c0_i32_0 = arith.constant 0 : i32
    %c0_i32_1 = arith.constant 0 : i32
    return %c0_i32, %c0_i32_0 : i32, i32
  }
  func.func @transform_5(%arg0: i32) -> (i32, i32, i32) {
    %c0_i32 = arith.constant 0 : i32
    %c0_i32_0 = arith.constant 0 : i32
    %c0_i32_1 = arith.constant 0 : i32
    return %arg0, %c0_i32, %c0_i32_0 : i32, i32, i32
  }
}

</mosaic_0001>

<bundles_post_ra>
// kernel: _lambda_.1
= control target key start
LH: loop header
LB: loop body
LE: loop exit
PB: predicated region body
PF: predicated region fallthrough
CT: control target
= control target key end

     0   :  { %s3250_s18 = smov 0   ;;  %s4084_s0 = inlined_call_operand.vmem [shape: f32[2,8,32], index: 0, kind: input, shape index: {}]   ;;  %s4085_s1 = inlined_call_operand.vmem [shape: f32[2,8,32], index: 1, kind: input, shape index: {}]   ;;  %s4086_s2 = inlined_call_operand.vmem [shape: f32[2,8,32], index: 2, kind: input, shape index: {}]   ;;  %s4087_s3 = inlined_call_operand.vmem [shape: f32[56,8], index: 3, kind: input, shape index: {}]   ;;  %s4088_s4 = inlined_call_operand.vmem [shape: f32[56,8], index: 4, kind: input, shape index: {}]   ;;  %s4089_s5 = inlined_call_operand.vmem [shape: f32[2,56,32], index: 5, kind: output, shape index: {}]  }
   0x1 LB: > { %s2294_s19 = sadd.s32 4294967295, %s3208_s18   ;;  %p2298_p0 = scmp.ge.s32.totalorder %s3208_s18, 1  ;;  %s3208_s18 = sphi %s3250_s18, %s15_s18  }
   0x2   : > { %p204_p1 = scmp.lt.s32.totalorder %s3208_s18, 3 }
   0x4   : > { %p205_p2 = pnand %p2298_p0, %p204_p1 }
   0x5   : > { %p239_p3 = scmp.lt.s32.totalorder (!%p205_p2), %s2294_s19, 1  ;;  %v3210_v0 = vmov (!%p205_p2), 0.0   ;;  %vm3211_vm0 = vmmov (!%p205_p2), 0   ;;  %v260_v1 = vld [vmem:[%s4087_s3 + $0x20] sm:$0xff] (!%p205_p2)  ;;  %vm264_vm1 = vcmask (!%p205_p2), 64512   ;;  %v261_v6 = vld [vmem:[%s4087_s3 + $0x28] sm:$0xff] (!%p205_p2) }
   0x6   : > { %208 = sbr.rel (%p205_p2) target bundleno = 1436 (0x59c), region = 40  ;;  %2979 = vmatprep.subr.mxu1 (!%p205_p2), %v3210_v0  ;;  %2560 = vmatprep.mubr.msk.f32.mxu1 (!%p205_p2), %vm3211_vm0, %v3210_v0  ;;  %v256_v4 = vld [vmem:[%s4087_s3] sm:$0xff] (!%p205_p2)  ;;  %v257_v7 = vld [vmem:[%s4087_s3 + $0x8] sm:$0xff] (!%p205_p2)  ;;  %v262_v8 = vld [vmem:[%s4087_s3 + $0x30] sm:$0xff] (!%p205_p2)  ;;  %v3212_v18 = vmov (!%p205_p2), 0.0|0.0   ;;  %s3213_s10 = smov (!%p205_p2), 120  }
   0x7   : > { %2546 = vmatprep.subr.mxu0 (!%p205_p2), %v3210_v0  ;;  %2548 = vmatprep.mubr.msk.f32.mxu0 (!%p205_p2), %vm3211_vm0, %v3210_v0  ;;  %v258_v9 = vld [vmem:[%s4087_s3 + $0x10] sm:$0xff] (!%p205_p2)  ;;  %v386_v10 = vld [vmem:[%s4088_s4] sm:$0xff] (!%p205_p2)  ;;  %v259_v11 = vld [vmem:[%s4087_s3 + $0x18] sm:$0xff] (!%p205_p2)  ;;  %s3214_s11 = smov (!%p205_p2), 112   ;;  %s3215_s12 = smov (!%p205_p2), 104   ;;  %vm769_vm4 = vcmask (!%p205_p2), 457728  }
   0x8   : > { %v387_v12 = vld [vmem:[%s4088_s4 + $0x8] sm:$0xff] (!%p205_p2)  ;;  %v388_v13 = vld [vmem:[%s4088_s4 + $0x10] sm:$0xff] (!%p205_p2)  ;;  %v389_v14 = vld [vmem:[%s4088_s4 + $0x18] sm:$0xff] (!%p205_p2)  ;;  %s3218_s17 = smov (!%p205_p2), 16   ;;  %vm2135_vm5 = vcmask (!%p205_p2), 130112   ;;  %vm2171_vm6 = vcmask (!%p205_p2), 195712  }
   0x9   : > { %v390_v15 = vld [vmem:[%s4088_s4 + $0x20] sm:$0xff] (!%p205_p2)  ;;  %v391_v16 = vld [vmem:[%s4088_s4 + $0x28] sm:$0xff] (!%p205_p2)  ;;  %v392_v17 = vld [vmem:[%s4088_s4 + $0x30] sm:$0xff] (!%p205_p2)  ;;  %vm2207_vm7 = vcmask (!%p205_p2), 261312  }
   0xa   : > { %vm3391_vm2 = vmpackc.low (!%p205_p2), %vm264_vm1, %vm264_vm1 }
   0xd   : > { %s4093_s19 = smov (!%p239_p3, %s2294_s19), 1 }
   0xe   : > { %s2299_s20 = sshll.u32 %s4093_s19, 3  ;;  %s2981_s13 = smul.u32 56, %s4093_s19 }
   0xf   : > { %s242_s23 = scalar_lea.vmem %s4084_s0, %s2299_s20  ;;  %s246_s28 = scalar_lea.vmem %s4085_s1, %s2299_s20 }
  0x10   : > { %v263_v2 = vld [vmem:[%s242_s23] sm:$0xff]  ;;  %s250_s6 = scalar_lea.vmem %s4086_s2, %s2299_s20  ;;  %s4018_s16 = scalar_lea.vmem %s4089_s5, %s2981_s13 }
  0x11   : > { %v393_v3 = vld [vmem:[%s246_s28] sm:$0xff]  ;;  %2980 = vmatpush3.msra.mxu1 %v263_v2  ;;  %2547 = vmatpush3.msra.mxu0 %v263_v2  ;;  %s3217_s19 = smov 8   ;;  %s3219_s20 = smov 24  }
  0x12   : > { %2561 = vmatmul.mubr.msk.f32.vlgmr.msra.gmra.mrb[0].mxu1 %vm264_vm1, %v260_v1  ;;  %2569 = vmatprep.subr.mxu1 %v3210_v0  ;;  %v515_v5 = vld [vmem:[%s250_s6] sm:$0xff] }
  0x13   : > { %2563 = vmatprep.mubr.msk.f32.mxu1 %vm3211_vm0, %v3210_v0  ;;  %2570 = vmatpush3.msra.mxu1 %v393_v3 }
  0x14   : > { %2549 = vmatmul.mubr.msk.f32.vlgmr.msra.gmra.mrb[0].mxu0 %vm264_vm1, %v256_v4  ;;  %2592 = vmatprep.subr.mxu0 %v3210_v0 }
  0x15   : > { %2551 = vmatprep.mubr.msk.f32.mxu0 %vm3211_vm0, %v3210_v0  ;;  %2593 = vmatpush3.msra.mxu0 %v515_v5 }
  0x16   : > { %2564 = vmatmul.mubr.msk.f32.gmra.mrb[2].mxu1 %vm264_vm1, %v261_v6  ;;  %2895 = vmatprep.subr.bf16.mxu1 %v3212_v18 }
  0x17   : > { %2566 = vmatprep.mubr.msk.f32.mxu1 %vm3211_vm0, %v3210_v0  ;;  %2907 = vmatprep.subr.bf16.mxu0 %v3212_v18 }
  0x18   : > { %2552 = vmatmul.mubr.msk.f32.gmra.mrb[2].mxu0 %vm264_vm1, %v257_v7 }
  0x19   : > { %2554 = vmatprep.mubr.msk.f32.mxu0 %vm3211_vm0, %v3210_v0 }
  0x1a   : > { %2567 = vmatmul.mubr.msk.f32.gmra.mrb[4].mxu1 %vm264_vm1, %v262_v8 }
  0x1b   : > { %2571 = vmatprep.mubr.msk.f32.mxu1 %vm3211_vm0, %v3210_v0 }
  0x1c   : > { %2555 = vmatmul.mubr.msk.f32.gmra.mrb[4].mxu0 %vm264_vm1, %v258_v9 }
  0x1d   : > { %2557 = vmatprep.mubr.msk.f32.mxu0 %vm3211_vm0, %v3210_v0 }
  0x1e   : > { %2572 = vmatmul.mubr.msk.f32.vlgmr.msra.gmra.mrb[6].mxu1 %vm264_vm1, %v386_v10 }
  0x1f   : > { %2574 = vmatprep.mubr.msk.f32.mxu1 %vm3211_vm0, %v3210_v0 }
  0x20   : > { %2558 = vmatmul.mubr.msk.f32.gmra.mrb[6].mxu0 %vm264_vm1, %v259_v11 }
  0x21   : > { %2594 = vmatprep.mubr.msk.f32.mxu0 %vm3211_vm0, %v3210_v0 }
  0x22   : > { %2575 = vmatmul.mubr.msk.f32.gmra.mrb[8].mxu1 %vm264_vm1, %v387_v12 }
  0x23   : > { %2577 = vmatprep.mubr.msk.f32.mxu1 %vm3211_vm0, %v3210_v0 }
  0x24   : > { %2595 = vmatmul.mubr.msk.f32.vlgmr.msra.gmra.mrb[8].mxu0 %vm264_vm1, %v386_v10 }
  0x25   : > { %2597 = vmatprep.mubr.msk.f32.mxu0 %vm3211_vm0, %v3210_v0 }
  0x26   : > { %2578 = vmatmul.mubr.msk.f32.gmra.mrb[10].mxu1 %vm264_vm1, %v388_v13 }
  0x27   : > { %2580 = vmatprep.mubr.msk.f32.mxu1 %vm3211_vm0, %v3210_v0 }
  0x28   : > { %2598 = vmatmul.mubr.msk.f32.gmra.mrb[10].mxu0 %vm264_vm1, %v387_v12 }
  0x29   : > { %2600 = vmatprep.mubr.msk.f32.mxu0 %vm3211_vm0, %v3210_v0 }
  0x2a   : > { %2581 = vmatmul.mubr.msk.f32.gmra.mrb[12].mxu1 %vm264_vm1, %v389_v14 }
  0x2b   : > { %2583 = vmatprep.mubr.msk.f32.mxu1 %vm3211_vm0, %v3210_v0 }
  0x2c   : > { %2601 = vmatmul.mubr.msk.f32.gmra.mrb[12].mxu0 %vm264_vm1, %v388_v13 }
  0x2d   : > { %2603 = vmatprep.mubr.msk.f32.mxu0 %vm3211_vm0, %v3210_v0 }
  0x2e   : > { %2584 = vmatmul.mubr.msk.f32.gmra.mrb[14].mxu1 %vm264_vm1, %v390_v15 }
  0x2f   : > { %2586 = vmatprep.mubr.msk.f32.mxu1 %vm3211_vm0, %v3210_v0 }
  0x30   : > { %2604 = vmatmul.mubr.msk.f32.gmra.mrb[14].mxu0 %vm264_vm1, %v389_v14 }
  0x31   : > { %2606 = vmatprep.mubr.msk.f32.mxu0 %vm3211_vm0, %v3210_v0 }
  0x32   : > { %2587 = vmatmul.mubr.msk.f32.gmra.mrb[16].mxu1 %vm264_vm1, %v391_v16 }
  0x33   : > { %2589 = vmatprep.mubr.msk.f32.mxu1 %vm3211_vm0, %v3210_v0 }
  0x34   : > { %2607 = vmatmul.mubr.msk.f32.gmra.mrb[16].mxu0 %vm264_vm1, %v390_v15 }
  0x35   : > { %2609 = vmatprep.mubr.msk.f32.mxu0 %vm3211_vm0, %v3210_v0 }
  0x36   : > { %2590 = vmatmul.mubr.msk.f32.gmra.mrb[18].mxu1 %vm264_vm1, %v392_v17 }
  0x37   : > { %2629 = vmatprep.mubr.msk.f32.mxu1 %vm3211_vm0, %v3210_v0 }
  0x38   : > { %2610 = vmatmul.mubr.msk.f32.gmra.mrb[18].mxu0 %vm264_vm1, %v391_v16 }
  0x39   : > { %2612 = vmatprep.mubr.msk.f32.mxu0 %vm3211_vm0, %v3210_v0 }
  0x3c   : > { %2613 = vmatmul.mubr.msk.f32.gmra.mrb[20].mxu0 %vm264_vm1, %v392_v17 }
  0x3d   : > { %2664 = vmatprep.mubr.msk.f32.mxu0 %vm3211_vm0, %v3210_v0 }
  0xe5   : > { %v3385_v19 = vpop.f32.mrb[0].mxu1 }
  0xe6   : > { %v2562_v20 = vpop.f32.mrb[1].mxu1  ;;  %v624_v59 = vmul.f32 0.35355338, %v3385_v19 }
  0xe7   : > { %v352_v21 = vpop.f32.mrb[0].mxu0 }
  0xe8   : > { %v2550_v22 = vpop.f32.mrb[1].mxu0  ;;  %v620_v56 = vmul.f32 0.35355338, %v352_v21 }
  0xe9   : > { %v377_v23 = vpop.f32.mrb[2].mxu1 }
  0xea   : > { %v2565_v24 = vpop.f32.mrb[3].mxu1  ;;  %v3415_v57 = vmul.f32 0.35355338, %v377_v23 }
  0xeb   : > { %v357_v25 = vpop.f32.mrb[2].mxu0 }
  0xec   : > { %v2553_v26 = vpop.f32.mrb[3].mxu0  ;;  %v621_v48 = vmul.f32 0.35355338, %v357_v25 }
  0xed   : > { %v3387_v27 = vpop.f32.mrb[4].mxu1 }
  0xee   : > { %v2568_v28 = vpop.f32.mrb[5].mxu1  ;;  %v626_v60 = vmul.f32 0.35355338, %v3387_v27 }
  0xef   : > { %v362_v29 = vpop.f32.mrb[4].mxu0 }
  0xf0   : > { %v2556_v30 = vpop.f32.mrb[5].mxu0  ;;  %v622_v53 = vmul.f32 0.35355338, %v362_v29 }
  0xf1   : > { %v481_v31 = vpop.f32.mrb[6].mxu1 }
  0xf2   : > { %v2573_v32 = vpop.f32.mrb[7].mxu1 }
  0xf3   : > { %v367_v33 = vpop.f32.mrb[6].mxu0 }
  0xf4   : > { %v2559_v34 = vpop.f32.mrb[7].mxu0  ;;  %v623_v58 = vmul.f32 0.35355338, %v367_v33 }
  0xf5   : > { %v486_v35 = vpop.f32.mrb[8].mxu1 }
  0xf6   : > { %v2896_v37 = vpack.c.bf16 %v486_v35, %v481_v31  ;;  %v2576_v38 = vpop.f32.mrb[9].mxu1  ;;  %v3000_v39 = vpack.i.bf16 %v486_v35, %v481_v31 }
  0xf7   : > { %v582_v61 = vpop.f32.mrb[8].mxu0 }
  0xf8   : > { %3001 = vrot.lane.b32.xlu0 %v3000_v39, %s3213_s10  ;;  %2898 = vmatpush3.bf16.xpose.msk.msra.mxu1 %vm3391_vm2, %v2896_v37  ;;  %v2596_v62 = vpop.f32.mrb[9].mxu0 }
  0xf9   : > { %v491_v40 = vpop.f32.mrb[10].mxu1  ;;  %2899 = vmatprep.subr.bf16.mxu1 %v3212_v18 }
  0xfa   : > { %v2579_v41 = vpop.f32.mrb[11].mxu1 }
  0xfb   : > { %v587_v63 = vpop.f32.mrb[10].mxu0 }
  0xfc   : > { %v2908_v1 = vpack.c.bf16 %v587_v63, %v582_v61  ;;  %v2599_v2 = vpop.f32.mrb[11].mxu0  ;;  %v3469_v10 = vpack.i.bf16 %v587_v63, %v582_v61 }
  0xfd   : > { %v496_v42 = vpop.f32.mrb[12].mxu1 }
  0xfe   : > { %v2900_v43 = vpack.c.bf16 %v496_v42, %v491_v40  ;;  %v2582_v44 = vpop.f32.mrb[13].mxu1  ;;  %v3005_v45 = vpack.i.bf16 %v496_v42, %v491_v40  ;;  %2909 = vmatpush3.bf16.msra.mxu0 %v2908_v1 }
  0xff   : > { %v592_v3 = vpop.f32.mrb[12].mxu0  ;;  %2910 = vmatprep.subr.bf16.mxu0 %v3212_v18 }
 0x100   : > { %3006 = vrot.lane.b32.xlu0 %v3005_v45, %s3213_s10  ;;  %2902 = vmatpush3.bf16.xpose.msk.msra.mxu1 %vm3391_vm2, %v2900_v43  ;;  %v2602_v4 = vpop.f32.mrb[13].mxu0 }
 0x101   : > { %v501_v46 = vpop.f32.mrb[14].mxu1  ;;  %2903 = vmatprep.subr.bf16.mxu1 %v3212_v18 }
 0x102   : > { %v2585_v47 = vpop.f32.mrb[15].mxu1 }
 0x103   : > { %v597_v5 = vpop.f32.mrb[14].mxu0 }
 0x104   : > { %3016 = vrot.lane.b32.xlu0 %v3000_v39, %s3214_s11  ;;  %v3466_v6 = vpack.i.bf16 %v597_v5, %v592_v3  ;;  %v2911_v7 = vpack.c.bf16 %v597_v5, %v592_v3  ;;  %v2605_v8 = vpop.f32.mrb[15].mxu0 }
 0x105   : > { %v506_v49 = vpop.f32.mrb[16].mxu1 }
 0x106   : > { %v2904_v50 = vpack.c.bf16 %v506_v49, %v501_v46  ;;  %v2588_v51 = vpop.f32.mrb[17].mxu1  ;;  %v3010_v52 = vpack.i.bf16 %v506_v49, %v501_v46  ;;  %2912 = vmatpush3.bf16.msra.mxu0 %v2911_v7 }
 0x107   : > { %v602_v9 = vpop.f32.mrb[16].mxu0  ;;  %2913 = vmatprep.subr.bf16.mxu0 %v3212_v18 }
 0x108   : > { %3011 = vrot.lane.b32.xlu1 %v3010_v52, %s3213_s10  ;;  %2906 = vmatpush3.bf16.xpose.msk.msra.mxu1 %vm3391_vm2, %v2904_v50  ;;  %v2608_v11 = vpop.f32.mrb[17].mxu0 }
 0x109   : > { %970 = vrot.lane.b32.xlu0 %v621_v48, %s3213_s10  ;;  %v511_v54 = vpop.f32.mrb[18].mxu1  ;;  %2627 = vmatprep.subr.mxu1 %v3210_v0 }
 0x10a   : > { %v2591_v55 = vpop.f32.mrb[19].mxu1 }
 0x10b   : > { %v607_v12 = vpop.f32.mrb[18].mxu0 }
 0x10c   : > { %994 = vrot.lane.b32.xlu1 %v511_v54, %s3213_s10  ;;  %v3472_v13 = vpack.i.bf16 %v607_v12, %v602_v9  ;;  %v2914_v14 = vpack.c.bf16 %v607_v12, %v602_v9  ;;  %v2611_v15 = vpop.f32.mrb[19].mxu0 }
 0x10d   : > { %972 = vrot.lane.b32.xlu0 %v622_v53, %s3213_s10 }
 0x10e   : > { %2915 = vmatpush3.bf16.msra.mxu0 %v2914_v14 }
 0x10f   : > { %v3476_v16 = vpop.f32.mrb[20].mxu0  ;;  %2662 = vmatprep.subr.mxu0 %v3210_v0 }
 0x110   : > { %2628 = vmatpush3.xpose.msk.msra.mxu1 %vm264_vm1, %v511_v54  ;;  %968 = vrot.lane.b32.xlu1 %v620_v56, %s3213_s10  ;;  %v2614_v17 = vpop.f32.mrb[21].mxu0 }
 0x111   : > { %3026 = vrot.lane.b32.xlu0 %v3010_v52, %s3214_s11  ;;  %2916 = vmatprep.subr.bf16.mxu1 %v3212_v18 }
 0x112   : > { %2663 = vmatpush3.msra.mxu0 %v3476_v16 }
 0x113   : > { %2630 = vmatmul.mubr.msk.f32.vlgmr.msra.gmra.mrb[20].mxu1 %vm264_vm1, %v620_v56  ;;  %2928 = vmatprep.subr.bf16.mxu0 %v3212_v18 }
 0x114   : > { %3021 = vrot.lane.b32.xlu1 %v3005_v45, %s3214_s11  ;;  %2632 = vmatprep.mubr.msk.f32.mxu1 %vm3211_vm0, %v3210_v0 }
 0x115   : > { %978 = vrot.lane.b32.xlu0 %v3415_v57, %s3213_s10 }
 0x117   : > { %2633 = vmatmul.mubr.msk.f32.gmra.mrb[22].mxu1 %vm264_vm1, %v621_v48 }
 0x118   : > { %974 = vrot.lane.b32.xlu1 %v623_v58, %s3213_s10  ;;  %2635 = vmatprep.mubr.msk.f32.mxu1 %vm3211_vm0, %v3210_v0 }
 0x119   : > { %1376 = vrot.lane.b32.xlu0 %v511_v54, %s3214_s11 }
 0x11b   : > { %2636 = vmatmul.mubr.msk.f32.gmra.mrb[24].mxu1 %vm264_vm1, %v622_v53 }
 0x11c   : > { %976 = vrot.lane.b32.xlu1 %v624_v59, %s3213_s10  ;;  %2638 = vmatprep.mubr.msk.f32.mxu1 %vm3211_vm0, %v3210_v0 }
 0x11d   : > { %1350 = vrot.lane.b32.xlu0 %v620_v56, %s3214_s11 }
 0x11f   : > { %2639 = vmatmul.mubr.msk.f32.gmra.mrb[26].mxu1 %vm264_vm1, %v623_v58 }
 0x120   : > { %980 = vrot.lane.b32.xlu1 %v626_v60, %s3213_s10  ;;  %2641 = vmatprep.mubr.msk.f32.mxu1 %vm3211_vm0, %v3210_v0 }
 0x121   : > { %3036 = vrot.lane.b32.xlu0 %v3005_v45, %s3215_s12 }
 0x123   : > { %2642 = vmatmul.mubr.msk.f32.gmra.mrb[28].mxu1 %vm264_vm1, %v624_v59 }
 0x124   : > { %3031 = vrot.lane.b32.xlu1 %v3000_v39, %s3215_s12  ;;  %2644 = vmatprep.mubr.msk.f32.mxu1 %vm3211_vm0, %v3210_v0 }
 0x125   : > { %1356 = vrot.lane.b32.xlu0 %v623_v58, %s3214_s11 }
 0x127   : > { %2645 = vmatmul.mubr.msk.f32.gmra.mrb[30].mxu1 %vm264_vm1, %v3415_v57 }
 0x128   : > { %1352 = vrot.lane.b32.xlu1 %v621_v48, %s3214_s11  ;;  %2647 = vmatprep.mubr.msk.f32.mxu1 %vm3211_vm0, %v3210_v0 }
 0x129   : > { %1358 = vrot.lane.b32.xlu0 %v624_v59, %s3214_s11 }
 0x12b   : > { %2648 = vmatmul.mubr.msk.f32.gmra.mrb[32].mxu1 %vm264_vm1, %v626_v60 }
 0x12c   : > { %1354 = vrot.lane.b32.xlu1 %v622_v53, %s3214_s11  ;;  %2699 = vmatprep.mubr.msk.f32.mxu1 %vm3211_vm0, %v3210_v0 }
 0x12d   : > { %1362 = vrot.lane.b32.xlu0 %v626_v60, %s3214_s11 }
 0x130   : > { %3041 = vrot.lane.b32.xlu1 %v3010_v52, %s3215_s12 }
 0x131   : > { %1725 = vrot.lane.b32.xlu0 %v620_v56, %s3215_s12 }
 0x134   : > { %1360 = vrot.lane.b32.xlu1 %v3415_v57, %s3214_s11 }
 0x135   : > { %1729 = vrot.lane.b32.xlu0 %v622_v53, %s3215_s12 }
 0x138   : > { %1751 = vrot.lane.b32.xlu1 %v511_v54, %s3215_s12 }
 0x139   : > { %1733 = vrot.lane.b32.xlu0 %v624_v59, %s3215_s12 }
 0x13c   : > { %1727 = vrot.lane.b32.xlu1 %v621_v48, %s3215_s12 }
 0x13d   : > { %1737 = vrot.lane.b32.xlu0 %v626_v60, %s3215_s12 }
 0x140   : > { %1731 = vrot.lane.b32.xlu1 %v623_v58, %s3215_s12 }
 0x141   : > { %3051 = vrot.lane.b32.xlu0 %v3466_v6, %s3213_s10 }
 0x144   : > { %1735 = vrot.lane.b32.xlu1 %v3415_v57, %s3215_s12 }
 0x145   : > { %3056 = vrot.lane.b32.xlu0 %v3469_v10, %s3214_s11 }
 0x148   : > { %3046 = vrot.lane.b32.xlu1 %v3469_v10, %s3213_s10 }
 0x149   : > { %3061 = vrot.lane.b32.xlu0 %v3472_v13, %s3213_s10 }
 0x14c   : > { %1220 = vrot.lane.b32.xlu1 %v3476_v16, %s3213_s10 }
 0x16a   : > { %v3002_v19 = vpop.permute.xlu0 %3001 }
 0x16b   : > { %v3004_v20 = vunpack.i.h.bf16 %v3002_v19  ;;  %v3003_v21 = vunpack.i.l.bf16 %v3002_v19 }
 0x16d   : > { %v2917_v22 = vpack.c.bf16 %v3004_v20, %v3003_v21  ;;  %v616_v21 = vlaneseq }
 0x16f   : > { %2919 = vmatpush3.bf16.xpose.msk.msra.mxu1 %vm3391_vm2, %v2917_v22  ;;  %v617_v22 = vand.u32 127, %v616_v21 }
 0x170   : > { %2920 = vmatprep.subr.bf16.mxu1 %v3212_v18 }
 0x171   : > { %vm618_vm3 = vcmp.lt.s32.totalorder %v617_v22, 52 }
 0x172   : > { %v3007_v23 = vpop.permute.xlu0 %3006 }
 0x173   : > { %v3009_v24 = vunpack.i.h.bf16 %v3007_v23  ;;  %v3008_v25 = vunpack.i.l.bf16 %v3007_v23  ;;  %v3216_v23 = vmov -1e+30  }
 0x175   : > { %v2921_v26 = vpack.c.bf16 %v3009_v24, %v3008_v25  ;;  %v3584_v24 = vsel %vm618_vm3, 0.0, %v3216_v23 }
 0x176   : > { %v3017_v30 = vpop.permute.xlu0 %3016 }
 0x177   : > { %2923 = vmatpush3.bf16.xpose.msk.msra.mxu1 %vm3391_vm2, %v2921_v26  ;;  %v3019_v35 = vunpack.i.h.bf16 %v3017_v30  ;;  %v3018_v37 = vunpack.i.l.bf16 %v3017_v30 }
 0x178   : > { %2924 = vmatprep.subr.bf16.mxu1 %v3212_v18 }
 0x179   : > { %v2938_v40 = vpack.c.bf16 %v3019_v35, %v3018_v37 }
 0x17a   : > { %v3012_v27 = vpop.permute.xlu1 %3011 }
 0x17b   : > { %v3014_v28 = vunpack.i.h.bf16 %v3012_v27  ;;  %v3013_v29 = vunpack.i.l.bf16 %v3012_v27  ;;  %v971_v33 = vpop.permute.xlu0 %970 }
 0x17d   : > { %v2925_v31 = vpack.c.bf16 %v3014_v28, %v3013_v29 }
 0x17e   : > { %v995_v32 = vpop.permute.xlu1 %994 }
 0x17f   : > { %2927 = vmatpush3.bf16.xpose.msk.msra.mxu1 %vm3391_vm2, %v2925_v31  ;;  %v973_v39 = vpop.permute.xlu0 %972 }
 0x180   : > { %2697 = vmatprep.subr.mxu1 %v3210_v0 }
 0x182   : > { %v969_v34 = vpop.permute.xlu1 %968 }
 0x183   : > { %v3027_v44 = vpop.permute.xlu0 %3026 }
 0x184   : > { %v3029_v48 = vunpack.i.h.bf16 %v3027_v44  ;;  %v3028_v49 = vunpack.i.l.bf16 %v3027_v44 }
 0x186   : > { %v3022_v38 = vpop.permute.xlu1 %3021  ;;  %v2946_v51 = vpack.c.bf16 %v3029_v48, %v3028_v49 }
 0x187   : > { %2698 = vmatpush3.xpose.msk.msra.mxu1 %vm264_vm1, %v995_v32  ;;  %v3024_v42 = vunpack.i.h.bf16 %v3022_v38  ;;  %v3023_v43 = vunpack.i.l.bf16 %v3022_v38  ;;  %v979_v47 = vpop.permute.xlu0 %978 }
 0x188   : > { %2937 = vmatprep.subr.bf16.mxu1 %v3212_v18 }
 0x189   : > { %v2942_v46 = vpack.c.bf16 %v3024_v42, %v3023_v43 }
 0x18a   : > { %v975_v41 = vpop.permute.xlu1 %974  ;;  %2700 = vmatmul.mubr.msk.f32.vlgmr.msra.gmra.mrb[34].mxu1 %vm264_vm1, %v969_v34 }
 0x18b   : > { %2940 = vmatpush3.bf16.xpose.msk.msra.mxu1 %vm3391_vm2, %v2938_v40  ;;  %2702 = vmatprep.mubr.msk.f32.mxu1 %vm3211_vm0, %v3210_v0  ;;  %v1377_v52 = vpop.permute.xlu0 %1376 }
 0x18c   : > { %2941 = vmatprep.subr.bf16.mxu1 %v3212_v18 }
 0x18e   : > { %2703 = vmatmul.mubr.msk.f32.gmra.mrb[36].mxu1 %vm264_vm1, %v971_v33  ;;  %v977_v45 = vpop.permute.xlu1 %976 }
 0x18f   : > { %2705 = vmatprep.mubr.msk.f32.mxu1 %vm3211_vm0, %v3210_v0  ;;  %v1351_v54 = vpop.permute.xlu0 %1350 }
 0x192   : > { %2706 = vmatmul.mubr.msk.f32.gmra.mrb[38].mxu1 %vm264_vm1, %v973_v39  ;;  %v981_v50 = vpop.permute.xlu1 %980 }
 0x193   : > { %2944 = vmatpush3.bf16.xpose.msk.msra.mxu1 %vm3391_vm2, %v2942_v46  ;;  %2708 = vmatprep.mubr.msk.f32.mxu1 %vm3211_vm0, %v3210_v0  ;;  %v3037_v59 = vpop.permute.xlu0 %3036 }
 0x194   : > { %2945 = vmatprep.subr.bf16.mxu1 %v3212_v18  ;;  %v3039_v61 = vunpack.i.h.bf16 %v3037_v59  ;;  %v3038_v62 = vunpack.i.l.bf16 %v3037_v59 }
 0x196   : > { %2709 = vmatmul.mubr.msk.f32.gmra.mrb[40].mxu1 %vm264_vm1, %v975_v41  ;;  %v3032_v53 = vpop.permute.xlu1 %3031  ;;  %v2963_v63 = vpack.c.bf16 %v3039_v61, %v3038_v62 }
 0x197   : > { %2711 = vmatprep.mubr.msk.f32.mxu1 %vm3211_vm0, %v3210_v0  ;;  %v3034_v55 = vunpack.i.h.bf16 %v3032_v53  ;;  %v3033_v56 = vunpack.i.l.bf16 %v3032_v53  ;;  %v1357_v2 = vpop.permute.xlu0 %1356 }
 0x199   : > { %v2959_v58 = vpack.c.bf16 %v3034_v55, %v3033_v56 }
 0x19a   : > { %2712 = vmatmul.mubr.msk.f32.gmra.mrb[42].mxu1 %vm264_vm1, %v977_v45  ;;  %v1353_v57 = vpop.permute.xlu1 %1352 }
 0x19b   : > { %2948 = vmatpush3.bf16.xpose.msk.msra.mxu1 %vm3391_vm2, %v2946_v51  ;;  %2714 = vmatprep.mubr.msk.f32.mxu1 %vm3211_vm0, %v3210_v0  ;;  %v1359_v5 = vpop.permute.xlu0 %1358 }
 0x19c   : > { %2767 = vmatprep.subr.mxu1 %v3210_v0 }
 0x19e   : > { %2715 = vmatmul.mubr.msk.f32.gmra.mrb[44].mxu1 %vm264_vm1, %v979_v47  ;;  %v1355_v60 = vpop.permute.xlu1 %1354 }
 0x19f   : > { %2717 = vmatprep.mubr.msk.f32.mxu1 %vm3211_vm0, %v3210_v0  ;;  %v1363_v9 = vpop.permute.xlu0 %1362 }
 0x1a2   : > { %2718 = vmatmul.mubr.msk.f32.gmra.mrb[46].mxu1 %vm264_vm1, %v981_v50  ;;  %v3042_v1 = vpop.permute.xlu1 %3041 }
 0x1a3   : > { %2768 = vmatpush3.xpose.msk.msra.mxu1 %vm264_vm1, %v1377_v52  ;;  %2769 = vmatprep.mubr.msk.f32.mxu1 %vm3211_vm0, %v3210_v0  ;;  %v3044_v3 = vunpack.i.h.bf16 %v3042_v1  ;;  %v3043_v4 = vunpack.i.l.bf16 %v3042_v1  ;;  %v1726_v36 = vpop.permute.xlu0 %1725 }
 0x1a4   : > { %2958 = vmatprep.subr.bf16.mxu1 %v3212_v18 }
 0x1a5   : > { %v2967_v7 = vpack.c.bf16 %v3044_v3, %v3043_v4 }
 0x1a6   : > { %2770 = vmatmul.mubr.msk.f32.vlgmr.msra.gmra.mrb[48].mxu1 %vm264_vm1, %v1351_v54  ;;  %v1361_v8 = vpop.permute.xlu1 %1360 }
 0x1a7   : > { %2961 = vmatpush3.bf16.xpose.msk.msra.mxu1 %vm3391_vm2, %v2959_v58  ;;  %2772 = vmatprep.mubr.msk.f32.mxu1 %vm3211_vm0, %v3210_v0  ;;  %v1730_v14 = vpop.permute.xlu0 %1729 }
 0x1a8   : > { %2962 = vmatprep.subr.bf16.mxu1 %v3212_v18 }
 0x1aa   : > { %2773 = vmatmul.mubr.msk.f32.gmra.mrb[50].mxu1 %vm264_vm1, %v1353_v57  ;;  %v1752_v11 = vpop.permute.xlu1 %1751 }
 0x1ab   : > { %2775 = vmatprep.mubr.msk.f32.mxu1 %vm3211_vm0, %v3210_v0  ;;  %v1734_v17 = vpop.permute.xlu0 %1733 }
 0x1ae   : > { %2776 = vmatmul.mubr.msk.f32.gmra.mrb[52].mxu1 %vm264_vm1, %v1355_v60  ;;  %v1728_v12 = vpop.permute.xlu1 %1727 }
 0x1af   : > { %2965 = vmatpush3.bf16.xpose.msk.msra.mxu1 %vm3391_vm2, %v2963_v63  ;;  %2778 = vmatprep.mubr.msk.f32.mxu1 %vm3211_vm0, %v3210_v0  ;;  %v1738_v20 = vpop.permute.xlu0 %1737 }
 0x1b0   : > { %2966 = vmatprep.subr.bf16.mxu1 %v3212_v18 }
 0x1b2   : > { %2779 = vmatmul.mubr.msk.f32.gmra.mrb[54].mxu1 %vm264_vm1, %v1357_v2  ;;  %v1732_v15 = vpop.permute.xlu1 %1731 }
 0x1b3   : > { %2781 = vmatprep.mubr.msk.f32.mxu1 %vm3211_vm0, %v3210_v0 }
 0x1b6   : > { %2782 = vmatmul.mubr.msk.f32.gmra.mrb[56].mxu1 %vm264_vm1, %v1359_v5  ;;  %v1736_v19 = vpop.permute.xlu1 %1735 }
 0x1b7   : > { %2969 = vmatpush3.bf16.xpose.msk.msra.mxu1 %vm3391_vm2, %v2967_v7  ;;  %2784 = vmatprep.mubr.msk.f32.mxu1 %vm3211_vm0, %v3210_v0 }
 0x1b8   : > { %2837 = vmatprep.subr.mxu1 %v3210_v0 }
 0x1ba   : > { %2785 = vmatmul.mubr.msk.f32.gmra.mrb[58].mxu1 %vm264_vm1, %v1361_v8 }
 0x1bb   : > { %2787 = vmatprep.mubr.msk.f32.mxu1 %vm3211_vm0, %v3210_v0 }
 0x1be   : > { %2788 = vmatmul.mubr.msk.f32.gmra.mrb[60].mxu1 %vm264_vm1, %v1363_v9 }
 0x1bf   : > { %2838 = vmatpush3.xpose.msk.msra.mxu1 %vm264_vm1, %v1752_v11  ;;  %2839 = vmatprep.mubr.msk.f32.mxu1 %vm3211_vm0, %v3210_v0 }
 0x1c2   : > { %2840 = vmatmul.mubr.msk.f32.vlgmr.msra.gmra.mrb[62].mxu1 %vm264_vm1, %v1726_v36 }
 0x1c3   : > { %2842 = vmatprep.mubr.msk.f32.mxu1 %vm3211_vm0, %v3210_v0 }
 0x1c6   : > { %2843 = vmatmul.mubr.msk.f32.gmra.mrb[64].mxu1 %vm264_vm1, %v1728_v12 }
 0x1c7   : > { %2845 = vmatprep.mubr.msk.f32.mxu1 %vm3211_vm0, %v3210_v0 }
 0x1ca   : > { %2846 = vmatmul.mubr.msk.f32.gmra.mrb[66].mxu1 %vm264_vm1, %v1730_v14 }
 0x1cb   : > { %2848 = vmatprep.mubr.msk.f32.mxu1 %vm3211_vm0, %v3210_v0 }
 0x1ce   : > { %2849 = vmatmul.mubr.msk.f32.gmra.mrb[68].mxu1 %vm264_vm1, %v1732_v15 }
 0x1cf   : > { %2851 = vmatprep.mubr.msk.f32.mxu1 %vm3211_vm0, %v3210_v0 }
 0x1d2   : > { %2852 = vmatmul.mubr.msk.f32.gmra.mrb[70].mxu1 %vm264_vm1, %v1734_v17 }
 0x1d3   : > { %2854 = vmatprep.mubr.msk.f32.mxu1 %vm3211_vm0, %v3210_v0 }
 0x1d6   : > { %2855 = vmatmul.mubr.msk.f32.gmra.mrb[72].mxu1 %vm264_vm1, %v1736_v19 }
 0x1d7   : > { %2857 = vmatprep.mubr.msk.f32.mxu1 %vm3211_vm0, %v3210_v0 }
 0x1da   : > { %2858 = vmatmul.mubr.msk.f32.gmra.mrb[74].mxu1 %vm264_vm1, %v1738_v20 }
 0x1e6   : > { %v735_v25 = vpop.f32.mrb[20].mxu1 }
 0x1e7   : > { %v3587_v26 = vadd.f32 %v735_v25, %v3584_v24  ;;  %v2631_v27 = vpop.f32.mrb[21].mxu1 }
 0x1e9   : > { %v770_v28 = vsel %vm769_vm4, %v3587_v26, -inf }
 0x1ea   : > { %v740_v29 = vpop.f32.mrb[22].mxu1  ;;  %771 = vmax.xlane.f32.xlu1 %v770_v28 }
 0x1eb   : > { %v3592_v30 = vadd.f32 %v740_v29, %v3584_v24  ;;  %v2634_v31 = vpop.f32.mrb[23].mxu1 }
 0x1ed   : > { %v773_v32 = vsel %vm769_vm4, %v3592_v30, -inf }
 0x1ee   : > { %v745_v33 = vpop.f32.mrb[24].mxu1  ;;  %774 = vmax.xlane.f32.xlu0 %v773_v32 }
 0x1ef   : > { %v3597_v34 = vadd.f32 %v745_v33, %v3584_v24  ;;  %v2637_v35 = vpop.f32.mrb[25].mxu1 }
 0x1f1   : > { %v776_v37 = vsel %vm769_vm4, %v3597_v34, -inf }
 0x1f2   : > { %v750_v38 = vpop.f32.mrb[26].mxu1  ;;  %777 = vmax.xlane.f32.xlu0 %v776_v37 }
 0x1f3   : > { %v3602_v39 = vadd.f32 %v750_v38, %v3584_v24  ;;  %v2640_v40 = vpop.f32.mrb[27].mxu1 }
 0x1f5   : > { %v779_v41 = vsel %vm769_vm4, %v3602_v39, -inf }
 0x1f6   : > { %v755_v42 = vpop.f32.mrb[28].mxu1  ;;  %780 = vmax.xlane.f32.xlu1 %v779_v41 }
 0x1f7   : > { %v3607_v43 = vadd.f32 %v755_v42, %v3584_v24  ;;  %v2643_v44 = vpop.f32.mrb[29].mxu1 }
 0x1f9   : > { %v782_v45 = vsel %vm769_vm4, %v3607_v43, -inf }
 0x1fa   : > { %v760_v46 = vpop.f32.mrb[30].mxu1  ;;  %783 = vmax.xlane.f32.xlu0 %v782_v45 }
 0x1fb   : > { %v3612_v47 = vadd.f32 %v760_v46, %v3584_v24  ;;  %v2646_v48 = vpop.f32.mrb[31].mxu1 }
 0x1fd   : > { %v785_v49 = vsel %vm769_vm4, %v3612_v47, -inf }
 0x1fe   : > { %v765_v50 = vpop.f32.mrb[32].mxu1  ;;  %786 = vmax.xlane.f32.xlu1 %v785_v49  ;;  %v3672_v49 = vpop.permute.xlu0 %3051 }
 0x1ff   : > { %v3617_v51 = vadd.f32 %v765_v50, %v3584_v24  ;;  %v2649_v52 = vpop.f32.mrb[33].mxu1  ;;  %v3674_v50 = vpop.permute.xlu1 %3046 }
 0x201   : > { %v788_v53 = vsel %vm769_vm4, %v3617_v51, -inf }
 0x202   : > { %789 = vmax.xlane.f32.xlu0 %v788_v53 }
 0x25d   : > { %v1090_v54 = vpop.f32.mrb[34].mxu1 }
 0x25e   : > { %v3622_v55 = vadd.f32 %v1090_v54, %v3584_v24  ;;  %v2701_v56 = vpop.f32.mrb[35].mxu1  ;;  %v3676_v54 = vpop.permute.xlu1 %1220 }
 0x260   : > { %v1124_v57 = vsel %vm769_vm4, %v3622_v55, -inf }
 0x261   : > { %v1095_v58 = vpop.f32.mrb[36].mxu1  ;;  %1125 = vmax.xlane.f32.xlu1 %v1124_v57 }
 0x262   : > { %v3627_v59 = vadd.f32 %v1095_v58, %v3584_v24  ;;  %v2704_v60 = vpop.f32.mrb[37].mxu1  ;;  %v3678_v58 = vpop.permute.xlu0 %3056 }
 0x264   : > { %v1127_v61 = vsel %vm769_vm4, %v3627_v59, -inf }
 0x265   : > { %v1100_v62 = vpop.f32.mrb[38].mxu1  ;;  %1128 = vmax.xlane.f32.xlu0 %v1127_v61 }
 0x266   : > { %v3632_v63 = vadd.f32 %v1100_v62, %v3584_v24  ;;  %v2707_v1 = vpop.f32.mrb[39].mxu1 }
 0x267   : > { %v3680_v1 = vpop.permute.xlu0 %3061 }
 0x268   : > { %v1130_v2 = vsel %vm769_vm4, %v3632_v63, -inf }
 0x269   : > { %v1105_v3 = vpop.f32.mrb[40].mxu1  ;;  %1131 = vmax.xlane.f32.xlu1 %v1130_v2 }
 0x26a   : > { %v3637_v4 = vadd.f32 %v1105_v3, %v3584_v24  ;;  %v2710_v5 = vpop.f32.mrb[41].mxu1 }
 0x26c   : > { %v1133_v7 = vsel %vm769_vm4, %v3637_v4, -inf }
 0x26d   : > { %v1110_v8 = vpop.f32.mrb[42].mxu1  ;;  %1134 = vmax.xlane.f32.xlu0 %v1133_v7 }
 0x26e   : > { %v3642_v9 = vadd.f32 %v1110_v8, %v3584_v24  ;;  %v2713_v11 = vpop.f32.mrb[43].mxu1 }
 0x270   : > { %v1136_v36 = vsel %vm769_vm4, %v3642_v9, -inf }
 0x271   : > { %v1115_v12 = vpop.f32.mrb[44].mxu1  ;;  %1137 = vmax.xlane.f32.xlu1 %v1136_v36 }
 0x272   : > { %v3647_v14 = vadd.f32 %v1115_v12, %v3584_v24  ;;  %v2716_v15 = vpop.f32.mrb[45].mxu1 }
 0x274   : > { %v1139_v17 = vsel %vm769_vm4, %v3647_v14, -inf }
 0x275   : > { %v1120_v19 = vpop.f32.mrb[46].mxu1  ;;  %1140 = vmax.xlane.f32.xlu0 %v1139_v17 }
 0x276   : > { %v3652_v20 = vadd.f32 %v1120_v19, %v3584_v24  ;;  %v2719_v21 = vpop.f32.mrb[47].mxu1 }
 0x277   : > { %v772_v60 = vpop.xlane.xlu1 %771 }
 0x278   : > { %v1142_v22 = vsel %vm769_vm4, %v3652_v20, -inf  ;;  %v791_v2 = vsub.f32 %v3587_v26, %v772_v60 }
 0x279   : > { %v1472_v23 = vpop.f32.mrb[48].mxu1  ;;  %1143 = vmax.xlane.f32.xlu1 %v1142_v22 }
 0x27a   : > { %v3657_v25 = vadd.f32 %v1472_v23, %v3584_v24  ;;  %v2771_v27 = vpop.f32.mrb[49].mxu1  ;;  %v798_v8 = vmul.f32 1.442695, %v791_v2 }
 0x27b   : > { %v775_v7 = vpop.xlane.xlu0 %774 }
 0x27c   : > { %v1506_v28 = vsel %vm769_vm4, %v3657_v25, -inf  ;;  %3090 = vpow2.f32 %v798_v8  ;;  %v792_v12 = vsub.f32 %v3592_v30, %v775_v7 }
 0x27d   : > { %v1477_v29 = vpop.f32.mrb[50].mxu1  ;;  %1507 = vmax.xlane.f32.xlu0 %v1506_v28 }
 0x27e   : > { %v3662_v31 = vadd.f32 %v1477_v29, %v3584_v24  ;;  %v2774_v32 = vpop.f32.mrb[51].mxu1  ;;  %v800_v21 = vmul.f32 1.442695, %v792_v12 }
 0x27f   : > { %v778_v15 = vpop.xlane.xlu0 %777 }
 0x280   : > { %v1509_v33 = vsel %vm769_vm4, %v3662_v31, -inf  ;;  %v793_v22 = vsub.f32 %v3597_v34, %v778_v15  ;;  %3092 = vpow2.f32 %v800_v21 }
 0x281   : > { %v1482_v35 = vpop.f32.mrb[52].mxu1  ;;  %1510 = vmax.xlane.f32.xlu1 %v1509_v33 }
 0x282   : > { %v2777_v37 = vpop.f32.mrb[53].mxu1  ;;  %v3690_v23 = vadd.f32 %v1482_v35, %v3584_v24  ;;  %v802_v28 = vmul.f32 1.442695, %v793_v22 }
 0x283   : > { %v781_v29 = vpop.xlane.xlu1 %780 }
 0x284   : > { %v1512_v30 = vsel %vm769_vm4, %v3690_v23, -inf  ;;  %3094 = vpow2.f32 %v802_v28  ;;  %v794_v34 = vsub.f32 %v3602_v39, %v781_v29 }
 0x285   : > { %v1487_v38 = vpop.f32.mrb[54].mxu1 }
 0x286   : > { %v2780_v40 = vpop.f32.mrb[55].mxu1  ;;  %v3695_v32 = vadd.f32 %v1487_v38, %v3584_v24  ;;  %v3699_v33 = vpop.eup %3090 }
 0x287   : > { %v784_v35 = vpop.xlane.xlu0 %783 }
 0x288   : > { %v1515_v38 = vsel %vm769_vm4, %v3695_v32, -inf }
 0x289   : > { %v1492_v41 = vpop.f32.mrb[56].mxu1 }
 0x28a   : > { %v2783_v42 = vpop.f32.mrb[57].mxu1  ;;  %v3703_v37 = vadd.f32 %v1492_v41, %v3584_v24 }
 0x28b   : > { %v812_v42 = vsel %vm769_vm4, %v3699_v33, 0.0 }
 0x28d   : > { %v1497_v44 = vpop.f32.mrb[58].mxu1 }
 0x28e   : > { %v2786_v45 = vpop.f32.mrb[59].mxu1  ;;  %v3706_v40 = vadd.f32 %v1497_v44, %v3584_v24  ;;  %v1518_v44 = vsel %vm769_vm4, %v3703_v37, -inf }
 0x28f   : > { %v804_v45 = vmul.f32 1.442695, %v794_v34  ;;  %v790_v2 = vpop.xlane.xlu0 %789 }
 0x290   : > { %v1521_v41 = vsel %vm769_vm4, %v3706_v40, -inf }
 0x291   : > { %v3666_v46 = vpop.f32.mrb[60].mxu1  ;;  %3096 = vpow2.f32 %v804_v45 }
 0x292   : > { %v2789_v48 = vpop.f32.mrb[61].mxu1  ;;  %3066 = vrot.lane.b32.xlu1 %v3466_v6, %s3214_s11 }
 0x293   : > { %3071 = vrot.lane.b32.xlu0 %v3472_v13, %s3214_s11  ;;  %v795_v48 = vsub.f32 %v3607_v43, %v784_v35 }
 0x295   : > { %v1847_v52 = vpop.f32.mrb[62].mxu1  ;;  %v806_v60 = vmul.f32 1.442695, %v795_v48 }
 0x296   : > { %v2841_v53 = vpop.f32.mrb[63].mxu1  ;;  %v3714_v39 = vadd.f32 %v1847_v52, %v3584_v24 }
 0x297   : > { %v787_v53 = vpop.xlane.xlu1 %786  ;;  %3098 = vpow2.f32 %v806_v60 }
 0x298   : > { %v1881_v52 = vsel %vm769_vm4, %v3714_v39, -inf }
 0x299   : > { %v1852_v56 = vpop.f32.mrb[64].mxu1 }
 0x29a   : > { %v2844_v57 = vpop.f32.mrb[65].mxu1  ;;  %v3724_v43 = vadd.f32 %v1852_v56, %v3584_v24 }
 0x29b   : > { %v3720_v57 = vpop.eup %3092 }
 0x29c   : > { %v3730_v7 = vpop.eup %3094  ;;  %v1884_v12 = vsel %vm769_vm4, %v3724_v43, -inf }
 0x29d   : > { %v1857_v61 = vpop.f32.mrb[66].mxu1  ;;  %v818_v15 = vsel %vm769_vm4, %v3730_v7, 0.0 }
 0x29e   : > { %v2847_v62 = vpop.f32.mrb[67].mxu1  ;;  %v3738_v56 = vadd.f32 %v1857_v61, %v3584_v24  ;;  %v3751_v61 = vpop.eup %3096 }
 0x29f   : > { %v796_v62 = vsub.f32 %v3612_v47, %v787_v53  ;;  %v3735_v47 = vadd.f32 %v3666_v46, %v3584_v24 }
 0x2a1   : > { %v1862_v3 = vpop.f32.mrb[68].mxu1  ;;  %v808_v8 = vmul.f32 1.442695, %v796_v62  ;;  %v1524_v46 = vsel %vm769_vm4, %v3735_v47, -inf  ;;  %v3761_v28 = vpop.eup %3098 }
 0x2a2   : > { %v2850_v5 = vpop.f32.mrb[69].mxu1  ;;  %v3745_v21 = vadd.f32 %v1862_v3, %v3584_v24  ;;  %v821_v3 = vsel %vm769_vm4, %v3751_v61, 0.0 }
 0x2a3   : > { %v815_v5 = vsel %vm769_vm4, %v3720_v57, 0.0  ;;  %3100 = vpow2.f32 %v808_v8 }
 0x2a5   : > { %v3683_v11 = vpop.f32.mrb[70].mxu1 }
 0x2a6   : > { %v2853_v36 = vpop.f32.mrb[71].mxu1  ;;  %v3755_v22 = vadd.f32 %v3683_v11, %v3584_v24  ;;  %v824_v11 = vsel %vm769_vm4, %v3761_v28, 0.0 }
 0x2a7   : > { %v797_v36 = vsub.f32 %v3617_v51, %v790_v2  ;;  %v1887_v51 = vsel %vm769_vm4, %v3738_v56, -inf }
 0x2a9   : > { %v3686_v17 = vpop.f32.mrb[72].mxu1 }
 0x2aa   : > { %v2856_v19 = vpop.f32.mrb[73].mxu1  ;;  %v3765_v29 = vadd.f32 %v3686_v17, %v3584_v24 }
 0x2ab   : > { %v810_v19 = vmul.f32 1.442695, %v797_v36 }
 0x2ad   : > { %v3692_v26 = vpop.f32.mrb[74].mxu1  ;;  %3102 = vpow2.f32 %v810_v19  ;;  %v3771_v34 = vpop.eup %3100 }
 0x2ae   : > { %v2859_v27 = vpop.f32.mrb[75].mxu1  ;;  %v3775_v35 = vadd.f32 %v3692_v26, %v3584_v24  ;;  %v827_v17 = vsel %vm769_vm4, %v3771_v34, 0.0 }
 0x2af   : > { %v1890_v27 = vsel %vm769_vm4, %v3745_v21, -inf }
 0x2b0   : > { %v1899_v45 = vsel %vm769_vm4, %v3775_v35, -inf }
 0x2b2   : > { %1513 = vmax.xlane.f32.xlu0 %v1512_v30  ;;  %v1893_v30 = vsel %vm769_vm4, %v3755_v22, -inf }
 0x2b6   : > { %1516 = vmax.xlane.f32.xlu1 %v1515_v38  ;;  %813 = vadd.xlane.f32.xlu0 %v812_v42  ;;  %v1896_v38 = vsel %vm769_vm4, %v3765_v29, -inf }
 0x2b7   : > { %v3781_v42 = vpop.eup %3102 }
 0x2b8   : > { %v830_v48 = vsel %vm769_vm4, %v3781_v42, 0.0 }
 0x2ba   : > { %1522 = vmax.xlane.f32.xlu1 %v1521_v41  ;;  %1519 = vmax.xlane.f32.xlu0 %v1518_v44 }
 0x2be   : > { %1882 = vmax.xlane.f32.xlu1 %v1881_v52  ;;  %816 = vadd.xlane.f32.xlu0 %v815_v5 }
 0x2c2   : > { %1885 = vmax.xlane.f32.xlu1 %v1884_v12  ;;  %819 = vadd.xlane.f32.xlu0 %v818_v15 }
 0x2c6   : > { %1888 = vmax.xlane.f32.xlu1 %v1887_v51  ;;  %1525 = vmax.xlane.f32.xlu0 %v1524_v46 }
 0x2ca   : > { %1891 = vmax.xlane.f32.xlu1 %v1890_v27  ;;  %822 = vadd.xlane.f32.xlu0 %v821_v3 }
 0x2ce   : > { %1894 = vmax.xlane.f32.xlu1 %v1893_v30  ;;  %825 = vadd.xlane.f32.xlu0 %v824_v11 }
 0x2d2   : > { %1897 = vmax.xlane.f32.xlu1 %v1896_v38  ;;  %828 = vadd.xlane.f32.xlu0 %v827_v17 }
 0x2d6   : > { %1900 = vmax.xlane.f32.xlu1 %v1899_v45  ;;  %831 = vadd.xlane.f32.xlu0 %v830_v48 }
 0x2ee   : > { %v1126_v24 = vpop.xlane.xlu1 %1125 }
 0x2ef   : > { %v1145_v26 = vsub.f32 %v3622_v55, %v1126_v24 }
 0x2f1   : > { %v1152_v53 = vmul.f32 1.442695, %v1145_v26 }
 0x2f2   : > { %v1129_v41 = vpop.xlane.xlu0 %1128 }
 0x2f3   : > { %3104 = vpow2.f32 %v1152_v53  ;;  %v1146_v44 = vsub.f32 %v3627_v59, %v1129_v41 }
 0x2f5   : > { %v1154_v60 = vmul.f32 1.442695, %v1146_v44 }
 0x2f6   : > { %v1132_v62 = vpop.xlane.xlu1 %1131 }
 0x2f7   : > { %3106 = vpow2.f32 %v1154_v60  ;;  %v1147_v2 = vsub.f32 %v3632_v63, %v1132_v62 }
 0x2f9   : > { %v1156_v52 = vmul.f32 1.442695, %v1147_v2 }
 0x2fa   : > { %v1135_v5 = vpop.xlane.xlu0 %1134 }
 0x2fb   : > { %3108 = vpow2.f32 %v1156_v52  ;;  %v1148_v8 = vsub.f32 %v3637_v4, %v1135_v5 }
 0x2fd   : > { %v3791_v36 = vpop.eup %3104  ;;  %v1158_v12 = vmul.f32 1.442695, %v1148_v8 }
 0x2fe   : > { %v1138_v15 = vpop.xlane.xlu1 %1137  ;;  %v1166_v55 = vsel %vm769_vm4, %v3791_v36, 0.0 }
 0x2ff   : > { %3110 = vpow2.f32 %v1158_v12  ;;  %v1149_v59 = vsub.f32 %v3642_v9, %v1138_v15  ;;  %1167 = vadd.xlane.f32.xlu1 %v1166_v55 }
 0x301   : > { %v3796_v19 = vpop.eup %3106  ;;  %v1160_v51 = vmul.f32 1.442695, %v1149_v59 }
 0x302   : > { %v1141_v63 = vpop.xlane.xlu0 %1140  ;;  %v1169_v46 = vsel %vm769_vm4, %v3796_v19, 0.0 }
 0x303   : > { %3112 = vpow2.f32 %v1160_v51  ;;  %v1150_v4 = vsub.f32 %v3647_v14, %v1141_v63  ;;  %1170 = vadd.xlane.f32.xlu0 %v1169_v46 }
 0x305   : > { %v3801_v27 = vpop.eup %3108  ;;  %v1162_v3 = vmul.f32 1.442695, %v1150_v4 }
 0x306   : > { %v1144_v30 = vpop.xlane.xlu1 %1143  ;;  %v1172_v11 = vsel %vm769_vm4, %v3801_v27, 0.0 }
 0x307   : > { %3114 = vpow2.f32 %v1162_v3  ;;  %v1151_v9 = vsub.f32 %v3652_v20, %v1144_v30  ;;  %1173 = vadd.xlane.f32.xlu1 %v1172_v11 }
 0x309   : > { %v3806_v38 = vpop.eup %3110  ;;  %v1164_v17 = vmul.f32 1.442695, %v1151_v9 }
 0x30a   : > { %v1508_v45 = vpop.xlane.xlu0 %1507  ;;  %v1175_v48 = vsel %vm769_vm4, %v3806_v38, 0.0 }
 0x30b   : > { %3116 = vpow2.f32 %v1164_v17  ;;  %v1527_v14 = vsub.f32 %v3657_v25, %v1508_v45  ;;  %1176 = vadd.xlane.f32.xlu0 %v1175_v48 }
 0x30d   : > { %v3811_v24 = vpop.eup %3112  ;;  %v1534_v26 = vmul.f32 1.442695, %v1527_v14 }
 0x30e   : > { %v1511_v53 = vpop.xlane.xlu1 %1510  ;;  %v1178_v41 = vsel %vm769_vm4, %v3811_v24, 0.0  ;;  %v3832_v12 = vpop.permute.xlu0 %3071 }
 0x30f   : > { %3118 = vpow2.f32 %v1534_v26  ;;  %v1528_v20 = vsub.f32 %v3662_v31, %v1511_v53  ;;  %1179 = vadd.xlane.f32.xlu0 %v1178_v41  ;;  %v3048_v26 = vunpack.i.l.bf16 %v3674_v50 }
 0x311   : > { %v3816_v44 = vpop.eup %3114  ;;  %v1536_v60 = vmul.f32 1.442695, %v1528_v20 }
 0x312   : > { %v1181_v62 = vsel %vm769_vm4, %v3816_v44, 0.0  ;;  %v3834_v15 = vpop.permute.xlu1 %3066 }
 0x313   : > { %3120 = vpow2.f32 %v1536_v60  ;;  %1182 = vadd.xlane.f32.xlu1 %v1181_v62  ;;  %v3053_v60 = vunpack.i.l.bf16 %v3672_v49 }
 0x315   : > { %v3820_v25 = vpop.eup %3116 }
 0x316   : > { %v1184_v2 = vsel %vm769_vm4, %v3820_v25, 0.0 }
 0x317   : > { %1185 = vadd.xlane.f32.xlu0 %v1184_v2 }
 0x319   : > { %v3824_v52 = vpop.eup %3118 }
 0x31a   : > { %v1548_v31 = vsel %vm769_vm4, %v3824_v52, 0.0 }
 0x31b   : > { %1549 = vadd.xlane.f32.xlu0 %v1548_v31 }
 0x31d   : > { %v3828_v5 = vpop.eup %3120 }
 0x31e   : > { %v1551_v8 = vsel %vm769_vm4, %v3828_v5, 0.0 }
 0x31f   : > { %1552 = vadd.xlane.f32.xlu0 %v1551_v8 }
 0x33f   : > { %v1514_v55 = vpop.xlane.xlu0 %1513 }
 0x340   : > { %v1529_v59 = vsub.f32 %v3690_v23, %v1514_v55  ;;  %v3049_v23 = vunpack.i.h.bf16 %v3674_v50  ;;  %v3064_v55 = vunpack.i.h.bf16 %v3680_v1 }
 0x342   : > { %v1538_v51 = vmul.f32 1.442695, %v1529_v59  ;;  %v2929_v62 = vpack.c.bf16 %v3049_v23, %v3048_v26  ;;  %v3063_v59 = vunpack.i.l.bf16 %v3680_v1 }
 0x343   : > { %v814_v63 = vpop.xlane.xlu0 %813  ;;  %v1517_v46 = vpop.xlane.xlu1 %1516 }
 0x344   : > { %3122 = vpow2.f32 %v1538_v51  ;;  %v1530_v4 = vsub.f32 %v3695_v32, %v1517_v46  ;;  %v2935_v1 = vpack.c.bf16 %v3064_v55, %v3063_v59 }
 0x345   : > { %3124 = vrcp.f32 %v814_v63 }
 0x346   : > { %v1540_v3 = vmul.f32 1.442695, %v1530_v4 }
 0x347   : > { %v1520_v30 = vpop.xlane.xlu0 %1519  ;;  %v1523_v11 = vpop.xlane.xlu1 %1522 }
 0x348   : > { %3126 = vpow2.f32 %v1540_v3  ;;  %v1531_v9 = vsub.f32 %v3703_v37, %v1520_v30  ;;  %v1532_v17 = vsub.f32 %v3706_v40, %v1523_v11  ;;  %v3054_v40 = vunpack.i.h.bf16 %v3672_v49 }
 0x34a   : > { %v1542_v45 = vmul.f32 1.442695, %v1531_v9  ;;  %v1544_v48 = vmul.f32 1.442695, %v1532_v17  ;;  %v2932_v49 = vpack.c.bf16 %v3054_v40, %v3053_v60 }
 0x34b   : > { %v817_v14 = vpop.xlane.xlu0 %816 }
 0x34c   : > { %3128 = vpow2.f32 %v1542_v45  ;;  %v1883_v45 = vpop.xlane.xlu1 %1882 }
 0x34d   : > { %3130 = vpow2.f32 %v1544_v48 }
 0x34e   : > { %v3842_v53 = vpop.eup %3122  ;;  %3132 = vrcp.f32 %v817_v14 }
 0x34f   : > { %v3125_v32 = vpop.eup %3124  ;;  %v820_v41 = vpop.xlane.xlu0 %819  ;;  %v1554_v20 = vsel %vm769_vm4, %v3842_v53, 0.0 }
 0x350   : > { %v840_v37 = vmul.f32 %v3125_v32, %v3699_v33  ;;  %1555 = vadd.xlane.f32.xlu1 %v1554_v20  ;;  %3134 = vrcp.f32 %v820_v41  ;;  %v1886_v14 = vpop.xlane.xlu1 %1885 }
 0x352   : > { %v3849_v2 = vpop.eup %3126  ;;  %2665 = vmatmul.mubr.msk.f32.vlgmr.msra.gmra.mrb[22].mxu0 %vm769_vm4, %v840_v37 }
 0x353   : > { %2930 = vmatpush3.bf16.msra.mxu0 %v2929_v62  ;;  %v1526_v50 = vpop.xlane.xlu0 %1525  ;;  %v1557_v31 = vsel %vm769_vm4, %v3849_v2, 0.0  ;;  %2667 = vmatprep.mubr.msk.f32.mxu0 %vm3211_vm0, %v3210_v0 }
 0x354   : > { %v1533_v33 = vsub.f32 %v3735_v47, %v1526_v50  ;;  %1558 = vadd.xlane.f32.xlu0 %v1557_v31  ;;  %2931 = vmatprep.subr.bf16.mxu0 %v3212_v18  ;;  %v1889_v20 = vpop.xlane.xlu1 %1888  ;;  %v1902_v50 = vsub.f32 %v3714_v39, %v1883_v45 }
 0x356   : > { %v3858_v8 = vpop.eup %3128  ;;  %v1546_v51 = vmul.f32 1.442695, %v1533_v33  ;;  %v1909_v31 = vmul.f32 1.442695, %v1902_v50 }
 0x357   : > { %v3862_v63 = vpop.eup %3130  ;;  %2933 = vmatpush3.bf16.msra.mxu0 %v2932_v49  ;;  %v823_v46 = vpop.xlane.xlu0 %822  ;;  %v1560_v4 = vsel %vm769_vm4, %v3858_v8, 0.0 }
 0x358   : > { %v3133_v3 = vpop.eup %3132  ;;  %3136 = vpow2.f32 %v1546_v51  ;;  %1561 = vadd.xlane.f32.xlu0 %v1560_v4  ;;  %v1563_v47 = vsel %vm769_vm4, %v3862_v63, 0.0  ;;  %2934 = vmatprep.subr.bf16.mxu0 %v3212_v18  ;;  %v1892_v60 = vpop.xlane.xlu1 %1891  ;;  %v1904_v4 = vsub.f32 %v3738_v56, %v1889_v20  ;;  %v3073_v20 = vunpack.i.l.bf16 %v3832_v12 }
 0x359   : > { %1564 = vadd.xlane.f32.xlu1 %v1563_v47  ;;  %v841_v30 = vmul.f32 %v3133_v3, %v3720_v57  ;;  %3138 = vrcp.f32 %v823_v46 }
 0x35a   : > { %v3135_v11 = vpop.eup %3134 }
 0x35b   : > { %2668 = vmatmul.mubr.msk.f32.gmra.mrb[24].mxu0 %vm769_vm4, %v841_v30  ;;  %v826_v9 = vpop.xlane.xlu0 %825  ;;  %v842_v17 = vmul.f32 %v3135_v11, %v3730_v7  ;;  %v1905_v30 = vsub.f32 %v3745_v21, %v1892_v60  ;;  %v3058_v11 = vunpack.i.l.bf16 %v3678_v58  ;;  %v3069_v21 = vunpack.i.h.bf16 %v3834_v15 }
 0x35c   : > { %2936 = vmatpush3.bf16.msra.mxu0 %v2935_v1  ;;  %2670 = vmatprep.mubr.msk.f32.mxu0 %vm3211_vm0, %v3210_v0  ;;  %3140 = vrcp.f32 %v826_v9  ;;  %v1895_v62 = vpop.xlane.xlu1 %1894  ;;  %v3059_v1 = vunpack.i.h.bf16 %v3678_v58 }
 0x35d   : > { %2732 = vmatprep.subr.mxu0 %v3210_v0  ;;  %v1906_v33 = vsub.f32 %v3755_v22, %v1895_v62  ;;  %v1903_v22 = vsub.f32 %v3724_v43, %v1886_v14  ;;  %v1913_v43 = vmul.f32 1.442695, %v1904_v4 }
 0x35e   : > { %v2950_v14 = vpack.c.bf16 %v3059_v1, %v3058_v11 }
 0x35f   : > { %2671 = vmatmul.mubr.msk.f32.gmra.mrb[26].mxu0 %vm769_vm4, %v842_v17  ;;  %v829_v48 = vpop.xlane.xlu0 %828 }
 0x360   : > { %2733 = vmatpush3.msra.mxu0 %v3676_v54  ;;  %2673 = vmatprep.mubr.msk.f32.mxu0 %vm3211_vm0, %v3210_v0  ;;  %3142 = vrcp.f32 %v829_v48  ;;  %v1915_v48 = vmul.f32 1.442695, %v1905_v30 }
 0x361   : > { %2949 = vmatprep.subr.bf16.mxu0 %v3212_v18 }
 0x362   : > { %v3880_v57 = vpop.eup %3136 }
 0x363   : > { %v832_v23 = vpop.xlane.xlu0 %831  ;;  %v1566_v7 = vsel %vm769_vm4, %v3880_v57, 0.0  ;;  %v3139_v26 = vpop.eup %3138 }
 0x364   : > { %1567 = vadd.xlane.f32.xlu0 %v1566_v7  ;;  %3144 = vrcp.f32 %v832_v23  ;;  %v843_v32 = vmul.f32 %v3139_v26, %v3751_v61  ;;  %v3068_v26 = vunpack.i.l.bf16 %v3834_v15  ;;  %v3074_v15 = vunpack.i.h.bf16 %v3832_v12 }
 0x365   : > { %3146 = vpow2.f32 %v1909_v31 }
 0x366   : > { %v3141_v41 = vpop.eup %3140  ;;  %2674 = vmatmul.mubr.msk.f32.gmra.mrb[28].mxu0 %vm769_vm4, %v843_v32  ;;  %v2956_v12 = vpack.c.bf16 %v3074_v15, %v3073_v20 }
 0x367   : > { %2676 = vmatprep.mubr.msk.f32.mxu0 %vm3211_vm0, %v3210_v0  ;;  %v844_v54 = vmul.f32 %v3141_v41, %v3761_v28 }
 0x36a   : > { %1595 = vrot.lane.b32.xlu1 %v3476_v16, %s3214_s11  ;;  %v3143_v37 = vpop.eup %3142  ;;  %2677 = vmatmul.mubr.msk.f32.gmra.mrb[30].mxu0 %vm769_vm4, %v844_v54 }
 0x36b   : > { %2679 = vmatprep.mubr.msk.f32.mxu0 %vm3211_vm0, %v3210_v0  ;;  %v845_v61 = vmul.f32 %v3143_v37, %v3771_v34  ;;  %v1898_v34 = vpop.xlane.xlu1 %1897  ;;  %v2953_v37 = vpack.c.bf16 %v3069_v21, %v3068_v26 }
 0x36c   : > { %v1907_v49 = vsub.f32 %v3765_v29, %v1898_v34 }
 0x36e   : > { %v3145_v40 = vpop.eup %3144  ;;  %2680 = vmatmul.mubr.msk.f32.gmra.mrb[32].mxu0 %vm769_vm4, %v845_v61  ;;  %v1919_v39 = vmul.f32 1.442695, %v1907_v49 }
 0x36f   : > { %2682 = vmatprep.mubr.msk.f32.mxu0 %vm3211_vm0, %v3210_v0  ;;  %v846_v28 = vmul.f32 %v3145_v40, %v3781_v42  ;;  %v1917_v42 = vmul.f32 1.442695, %v1906_v33  ;;  %v1901_v55 = vpop.xlane.xlu1 %1900  ;;  %v3912_v51 = vpop.eup %3146 }
 0x370   : > { %v1908_v59 = vsub.f32 %v3775_v35, %v1901_v55  ;;  %v1923_v29 = vsel %vm769_vm4, %v3912_v51, 0.0 }
 0x371   : > { %3148 = vpow2.f32 %v1917_v42 }
 0x372   : > { %2683 = vmatmul.mubr.msk.f32.gmra.mrb[34].mxu0 %vm769_vm4, %v846_v28  ;;  %3150 = vpow2.f32 %v1919_v39 }
 0x373   : > { %2734 = vmatprep.mubr.msk.f32.mxu0 %vm3211_vm0, %v3210_v0 }
 0x37a   : > { %3076 = vrot.lane.b32.xlu0 %v3469_v10, %s3215_s12  ;;  %v1921_v10 = vmul.f32 1.442695, %v1908_v59 }
 0x37b   : > { %v3917_v46 = vpop.eup %3148 }
 0x37c   : > { %3152 = vpow2.f32 %v1921_v10  ;;  %v1935_v35 = vsel %vm769_vm4, %v3917_v46, 0.0  ;;  %v3922_v47 = vpop.eup %3150 }
 0x37d   : > { %v1938_v56 = vsel %vm769_vm4, %v3922_v47, 0.0 }
 0x37e   : > { %3081 = vrot.lane.b32.xlu0 %v3466_v6, %s3215_s12 }
 0x382   : > { %3086 = vrot.lane.b32.xlu0 %v3472_v13, %s3215_s12  ;;  %v1911_v13 = vmul.f32 1.442695, %v1903_v22 }
 0x386   : > { %v3929_v17 = vpop.eup %3152 }
 0x387   : > { %v1941_v58 = vsel %vm769_vm4, %v3929_v17, 0.0 }
 0x38c   : > { %v1168_v6 = vpop.xlane.xlu1 %1167 }
 0x38d   : > { %3154 = vrcp.f32 %v1168_v6 }
 0x38e   : > { %1924 = vadd.xlane.f32.xlu1 %v1923_v29 }
 0x390   : > { %v1171_v3 = vpop.xlane.xlu0 %1170 }
 0x391   : > { %3156 = vrcp.f32 %v1171_v3 }
 0x392   : > { %1936 = vadd.xlane.f32.xlu1 %v1935_v35  ;;  %3158 = vpow2.f32 %v1911_v13 }
 0x394   : > { %v1174_v9 = vpop.xlane.xlu1 %1173 }
 0x395   : > { %3160 = vrcp.f32 %v1174_v9 }
 0x396   : > { %1939 = vadd.xlane.f32.xlu1 %v1938_v56  ;;  %3162 = vpow2.f32 %v1913_v43 }
 0x397   : > { %v3155_v45 = vpop.eup %3154 }
 0x398   : > { %v1194_v23 = vmul.f32 %v3155_v45, %v3791_v36  ;;  %v1177_v7 = vpop.xlane.xlu0 %1176 }
 0x399   : > { %3164 = vrcp.f32 %v1177_v7 }
 0x39a   : > { %1942 = vadd.xlane.f32.xlu1 %v1941_v58  ;;  %2735 = vmatmul.mubr.msk.f32.vlgmr.msra.gmra.mrb[36].mxu0 %vm769_vm4, %v1194_v23  ;;  %3166 = vpow2.f32 %v1915_v48 }
 0x39b   : > { %v3157_v32 = vpop.eup %3156  ;;  %2951 = vmatpush3.bf16.msra.mxu0 %v2950_v14  ;;  %2737 = vmatprep.mubr.msk.f32.mxu0 %vm3211_vm0, %v3210_v0 }
 0x39c   : > { %v1180_v41 = vpop.xlane.xlu0 %1179  ;;  %2952 = vmatprep.subr.bf16.mxu0 %v3212_v18  ;;  %v1195_v36 = vmul.f32 %v3157_v32, %v3796_v19  ;;  %v3941_v54 = vpop.eup %3158 }
 0x39d   : > { %3168 = vrcp.f32 %v1180_v41  ;;  %v1926_v60 = vsel %vm769_vm4, %v3941_v54, 0.0 }
 0x39e   : > { %2738 = vmatmul.mubr.msk.f32.gmra.mrb[38].mxu0 %vm769_vm4, %v1195_v36 }
 0x39f   : > { %v3161_v61 = vpop.eup %3160  ;;  %2954 = vmatpush3.bf16.msra.mxu0 %v2953_v37  ;;  %2740 = vmatprep.mubr.msk.f32.mxu0 %vm3211_vm0, %v3210_v0 }
 0x3a0   : > { %v1183_v40 = vpop.xlane.xlu1 %1182  ;;  %2955 = vmatprep.subr.bf16.mxu0 %v3212_v18  ;;  %v1196_v19 = vmul.f32 %v3161_v61, %v3801_v27  ;;  %v3952_v28 = vpop.eup %3162 }
 0x3a1   : > { %3170 = vrcp.f32 %v1183_v40  ;;  %1927 = vadd.xlane.f32.xlu0 %v1926_v60  ;;  %v1929_v34 = vsel %vm769_vm4, %v3952_v28, 0.0 }
 0x3a2   : > { %2741 = vmatmul.mubr.msk.f32.gmra.mrb[40].mxu0 %vm769_vm4, %v1196_v19 }
 0x3a3   : > { %v3165_v62 = vpop.eup %3164  ;;  %2957 = vmatpush3.bf16.msra.mxu0 %v2956_v12  ;;  %2743 = vmatprep.mubr.msk.f32.mxu0 %vm3211_vm0, %v3210_v0 }
 0x3a4   : > { %v1186_v50 = vpop.xlane.xlu0 %1185  ;;  %v1197_v31 = vmul.f32 %v3165_v62, %v3806_v38  ;;  %2802 = vmatprep.subr.mxu0 %v3210_v0  ;;  %v3961_v27 = vpop.eup %3166 }
 0x3a5   : > { %3172 = vrcp.f32 %v1186_v50  ;;  %1930 = vadd.xlane.f32.xlu0 %v1929_v34  ;;  %v1932_v42 = vsel %vm769_vm4, %v3961_v27, 0.0 }
 0x3a6   : > { %2744 = vmatmul.mubr.msk.f32.gmra.mrb[42].mxu0 %vm769_vm4, %v1197_v31 }
 0x3a7   : > { %v3169_v33 = vpop.eup %3168  ;;  %2746 = vmatprep.mubr.msk.f32.mxu0 %vm3211_vm0, %v3210_v0 }
 0x3a8   : > { %v1198_v49 = vmul.f32 %v3169_v33, %v3811_v24  ;;  %v1550_v24 = vpop.xlane.xlu0 %1549 }
 0x3a9   : > { %1933 = vadd.xlane.f32.xlu0 %v1932_v42  ;;  %3174 = vrcp.f32 %v1550_v24 }
 0x3aa   : > { %2747 = vmatmul.mubr.msk.f32.gmra.mrb[44].mxu0 %vm769_vm4, %v1198_v49 }
 0x3ab   : > { %v3171_v38 = vpop.eup %3170  ;;  %2749 = vmatprep.mubr.msk.f32.mxu0 %vm3211_vm0, %v3210_v0 }
 0x3ac   : > { %v1199_v55 = vmul.f32 %v3171_v38, %v3816_v44  ;;  %v1553_v10 = vpop.xlane.xlu0 %1552 }
 0x3ad   : > { %3176 = vrcp.f32 %v1553_v10 }
 0x3ae   : > { %2750 = vmatmul.mubr.msk.f32.gmra.mrb[46].mxu0 %vm769_vm4, %v1199_v55 }
 0x3af   : > { %v3173_v39 = vpop.eup %3172  ;;  %2752 = vmatprep.mubr.msk.f32.mxu0 %vm3211_vm0, %v3210_v0 }
 0x3b0   : > { %v1200_v59 = vmul.f32 %v3173_v39, %v3820_v25 }
 0x3b2   : > { %2753 = vmatmul.mubr.msk.f32.gmra.mrb[48].mxu0 %vm769_vm4, %v1200_v59 }
 0x3b3   : > { %2804 = vmatprep.mubr.msk.f32.mxu0 %vm3211_vm0, %v3210_v0  ;;  %v3175_v29 = vpop.eup %3174 }
 0x3b4   : > { %v1576_v25 = vmul.f32 %v3175_v29, %v3824_v52 }
 0x3b7   : > { %v3177_v3 = vpop.eup %3176 }
 0x3bf   : > { %1970 = vrot.lane.b32.xlu0 %v3476_v16, %s3215_s12  ;;  %v1577_v16 = vmul.f32 %v3177_v3, %v3828_v5 }
 0x3dd   : > { %v1556_v44 = vpop.xlane.xlu1 %1555 }
 0x3de   : > { %3178 = vrcp.f32 %v1556_v44 }
 0x3e1   : > { %v1559_v22 = vpop.xlane.xlu0 %1558 }
 0x3e2   : > { %3180 = vrcp.f32 %v1559_v22 }
 0x3e5   : > { %v1562_v13 = vpop.xlane.xlu0 %1561 }
 0x3e6   : > { %v1565_v6 = vpop.xlane.xlu1 %1564  ;;  %3182 = vrcp.f32 %v1562_v13 }
 0x3e7   : > { %3184 = vrcp.f32 %v1565_v6 }
 0x3e8   : > { %v3179_v35 = vpop.eup %3178 }
 0x3e9   : > { %v1578_v52 = vmul.f32 %v3179_v35, %v3842_v53 }
 0x3ea   : > { %v1596_v4 = vpop.permute.xlu1 %1595 }
 0x3eb   : > { %2803 = vmatpush3.msra.mxu0 %v1596_v4 }
 0x3ec   : > { %2805 = vmatmul.mubr.msk.f32.vlgmr.msra.gmra.mrb[50].mxu0 %vm769_vm4, %v1576_v25  ;;  %2970 = vmatprep.subr.bf16.mxu0 %v3212_v18  ;;  %v3181_v30 = vpop.eup %3180 }
 0x3ed   : > { %2807 = vmatprep.mubr.msk.f32.mxu0 %vm3211_vm0, %v3210_v0  ;;  %v1579_v9 = vmul.f32 %v3181_v30, %v3849_v2 }
 0x3f0   : > { %2808 = vmatmul.mubr.msk.f32.gmra.mrb[52].mxu0 %vm769_vm4, %v1577_v16  ;;  %v3183_v56 = vpop.eup %3182 }
 0x3f1   : > { %v1568_v43 = vpop.xlane.xlu0 %1567  ;;  %2810 = vmatprep.mubr.msk.f32.mxu0 %vm3211_vm0, %v3210_v0  ;;  %v1580_v23 = vmul.f32 %v3183_v56, %v3858_v8  ;;  %v3185_v7 = vpop.eup %3184 }
 0x3f2   : > { %3186 = vrcp.f32 %v1568_v43  ;;  %v1581_v32 = vmul.f32 %v3185_v7, %v3862_v63 }
 0x3f4   : > { %2811 = vmatmul.mubr.msk.f32.gmra.mrb[54].mxu0 %vm769_vm4, %v1578_v52 }
 0x3f5   : > { %v3077_v1 = vpop.permute.xlu0 %3076  ;;  %2813 = vmatprep.mubr.msk.f32.mxu0 %vm3211_vm0, %v3210_v0 }
 0x3f6   : > { %v3079_v11 = vunpack.i.h.bf16 %v3077_v1  ;;  %v3078_v5 = vunpack.i.l.bf16 %v3077_v1 }
 0x3f8   : > { %v2971_v45 = vpack.c.bf16 %v3079_v11, %v3078_v5  ;;  %2814 = vmatmul.mubr.msk.f32.gmra.mrb[56].mxu0 %vm769_vm4, %v1579_v9 }
 0x3f9   : > { %v3082_v48 = vpop.permute.xlu0 %3081  ;;  %2816 = vmatprep.mubr.msk.f32.mxu0 %vm3211_vm0, %v3210_v0 }
 0x3fa   : > { %v3084_v53 = vunpack.i.h.bf16 %v3082_v48  ;;  %v3083_v14 = vunpack.i.l.bf16 %v3082_v48  ;;  %2972 = vmatpush3.bf16.msra.mxu0 %v2971_v45 }
 0x3fb   : > { %2973 = vmatprep.subr.bf16.mxu0 %v3212_v18 }
 0x3fc   : > { %v2974_v21 = vpack.c.bf16 %v3084_v53, %v3083_v14  ;;  %2817 = vmatmul.mubr.msk.f32.gmra.mrb[58].mxu0 %vm769_vm4, %v1580_v23  ;;  %v3187_v41 = vpop.eup %3186 }
 0x3fd   : > { %v3087_v2 = vpop.permute.xlu0 %3086  ;;  %2819 = vmatprep.mubr.msk.f32.mxu0 %vm3211_vm0, %v3210_v0  ;;  %v1582_v36 = vmul.f32 %v3187_v41, %v3880_v57 }
 0x3fe   : > { %v3089_v26 = vunpack.i.h.bf16 %v3087_v2  ;;  %v3088_v58 = vunpack.i.l.bf16 %v3087_v2  ;;  %2975 = vmatpush3.bf16.msra.mxu0 %v2974_v21 }
 0x3ff   : > { %2976 = vmatprep.subr.bf16.mxu0 %v3212_v18 }
 0x400   : > { %v2977_v8 = vpack.c.bf16 %v3089_v26, %v3088_v58  ;;  %2820 = vmatmul.mubr.msk.f32.gmra.mrb[60].mxu0 %vm769_vm4, %v1581_v32 }
 0x401   : > { %2822 = vmatprep.mubr.msk.f32.mxu0 %vm3211_vm0, %v3210_v0 }
 0x402   : > { %2978 = vmatpush3.bf16.msra.mxu0 %v2977_v8 }
 0x403   : > { %2872 = vmatprep.subr.mxu0 %v3210_v0 }
 0x404   : > { %2823 = vmatmul.mubr.msk.f32.gmra.mrb[62].mxu0 %vm769_vm4, %v1582_v36 }
 0x405   : > { %2874 = vmatprep.mubr.msk.f32.mxu0 %vm3211_vm0, %v3210_v0 }
 0x41b   : > { %v1925_v57 = vpop.xlane.xlu1 %1924 }
 0x41c   : > { %3188 = vrcp.f32 %v1925_v57 }
 0x41f   : > { %v1937_v19 = vpop.xlane.xlu1 %1936 }
 0x423   : > { %v1940_v49 = vpop.xlane.xlu1 %1939 }
 0x425   : > { %v934_v18 = vpop.f32.mrb[22].mxu0 }
 0x426   : > { %2100 = vst.msk [vmem:[%s4018_s16] sm:$0xff] %vm264_vm1, %v934_v18  ;;  %v2666_v63 = vpop.f32.mrb[23].mxu0  ;;  %v3189_v62 = vpop.eup %3188 }
 0x427   : > { %v1951_v50 = vmul.f32 %v3189_v62, %v3912_v51  ;;  %v1943_v59 = vpop.xlane.xlu1 %1942 }
 0x42e   : > { %v939_v15 = vpop.f32.mrb[24].mxu0  ;;  %v1928_v20 = vpop.xlane.xlu0 %1927 }
 0x42f   : > { %2101 = vst.msk [vmem:[%s4018_s16 + $0x8] sm:$0xff] %vm264_vm1, %v939_v15  ;;  %v2669_v37 = vpop.f32.mrb[25].mxu0  ;;  %3190 = vrcp.f32 %v1928_v20 }
 0x432   : > { %v944_v61 = vpop.f32.mrb[26].mxu0  ;;  %v1931_v40 = vpop.xlane.xlu0 %1930 }
 0x433   : > { %2102 = vst.msk [vmem:[%s4018_s16 + $0x10] sm:$0xff] %vm264_vm1, %v944_v61  ;;  %v2672_v60 = vpop.f32.mrb[27].mxu0  ;;  %3192 = vrcp.f32 %v1931_v40 }
 0x436   : > { %v1934_v12 = vpop.xlane.xlu0 %1933 }
 0x437   : > { %3194 = vrcp.f32 %v1934_v12 }
 0x438   : > { %3196 = vrcp.f32 %v1937_v19 }
 0x439   : > { %v949_v34 = vpop.f32.mrb[28].mxu0  ;;  %v3191_v33 = vpop.eup %3190  ;;  %3198 = vrcp.f32 %v1940_v49 }
 0x43a   : > { %v1971_v31 = vpop.permute.xlu0 %1970  ;;  %2103 = vst.msk [vmem:[%s4018_s16 + $0x18] sm:$0xff] %vm264_vm1, %v949_v34  ;;  %v2675_v42 = vpop.f32.mrb[29].mxu0  ;;  %v1952_v55 = vmul.f32 %v3191_v33, %v3941_v54  ;;  %3200 = vrcp.f32 %v1943_v59 }
 0x43b   : > { %2873 = vmatpush3.msra.mxu0 %v1971_v31 }
 0x43c   : > { %2875 = vmatmul.mubr.msk.f32.vlgmr.msra.gmra.mrb[64].mxu0 %vm769_vm4, %v1951_v50 }
 0x43d   : > { %2877 = vmatprep.mubr.msk.f32.mxu0 %vm3211_vm0, %v3210_v0  ;;  %v954_v38 = vpop.f32.mrb[30].mxu0  ;;  %v3193_v39 = vpop.eup %3192 }
 0x43e   : > { %2104 = vst.msk [vmem:[%s4018_s16 + $0x20] sm:$0xff] %vm264_vm1, %v954_v38  ;;  %v2678_v51 = vpop.f32.mrb[31].mxu0  ;;  %v1953_v10 = vmul.f32 %v3193_v39, %v3952_v28 }
 0x440   : > { %2878 = vmatmul.mubr.msk.f32.gmra.mrb[66].mxu0 %vm769_vm4, %v1952_v55 }
 0x441   : > { %2880 = vmatprep.mubr.msk.f32.mxu0 %vm3211_vm0, %v3210_v0  ;;  %v959_v24 = vpop.f32.mrb[32].mxu0  ;;  %v3195_v44 = vpop.eup %3194 }
 0x442   : > { %2105 = vst.msk [vmem:[%s4018_s16 + $0x28] sm:$0xff] %vm264_vm1, %v959_v24  ;;  %v2681_v22 = vpop.f32.mrb[33].mxu0  ;;  %v1954_v6 = vmul.f32 %v3195_v44, %v3961_v27  ;;  %v3197_v29 = vpop.eup %3196 }
 0x443   : > { %v1955_v28 = vmul.f32 %v3197_v29, %v3917_v46  ;;  %v3199_v13 = vpop.eup %3198 }
 0x444   : > { %2881 = vmatmul.mubr.msk.f32.gmra.mrb[68].mxu0 %vm769_vm4, %v1953_v10  ;;  %v1956_v4 = vmul.f32 %v3199_v13, %v3922_v47  ;;  %v3201_v27 = vpop.eup %3200 }
 0x445   : > { %2883 = vmatprep.mubr.msk.f32.mxu0 %vm3211_vm0, %v3210_v0  ;;  %v964_v54 = vpop.f32.mrb[34].mxu0  ;;  %v1957_v3 = vmul.f32 %v3201_v27, %v3929_v17 }
 0x446   : > { %2106 = vst.msk [vmem:[%s4018_s16 + $0x30] sm:$0xff] %vm264_vm1, %v964_v54  ;;  %v2684_v25 = vpop.f32.mrb[35].mxu0 }
 0x448   : > { %2884 = vmatmul.mubr.msk.f32.gmra.mrb[70].mxu0 %vm769_vm4, %v1954_v6 }
 0x449   : > { %2886 = vmatprep.mubr.msk.f32.mxu0 %vm3211_vm0, %v3210_v0 }
 0x44c   : > { %2887 = vmatmul.mubr.msk.f32.gmra.mrb[72].mxu0 %vm769_vm4, %v1955_v28 }
 0x44d   : > { %2889 = vmatprep.mubr.msk.f32.mxu0 %vm3211_vm0, %v3210_v0 }
 0x450   : > { %2890 = vmatmul.mubr.msk.f32.gmra.mrb[74].mxu0 %vm769_vm4, %v1956_v4 }
 0x451   : > { %2892 = vmatprep.mubr.msk.f32.mxu0 %vm3211_vm0, %v3210_v0 }
 0x454   : > { %2893 = vmatmul.mubr.msk.f32.gmra.mrb[76].mxu0 %vm769_vm4, %v1957_v3 }
 0x46d   : > { %v1316_v16 = vpop.f32.mrb[36].mxu0 }
 0x46e   : > { %2114 = vrot.lane.b32.xlu1 %v1316_v16, %s3217_s19  ;;  %v2736_v46 = vpop.f32.mrb[37].mxu0 }
 0x471   : > { %v1321_v35 = vpop.f32.mrb[38].mxu0 }
 0x472   : > { %2116 = vrot.lane.b32.xlu0 %v1321_v35, %s3217_s19  ;;  %v2739_v43 = vpop.f32.mrb[39].mxu0 }
 0x475   : > { %v1326_v52 = vpop.f32.mrb[40].mxu0 }
 0x476   : > { %2118 = vrot.lane.b32.xlu0 %v1326_v52, %s3217_s19  ;;  %v2742_v47 = vpop.f32.mrb[41].mxu0 }
 0x479   : > { %v1331_v30 = vpop.f32.mrb[42].mxu0 }
 0x47a   : > { %2120 = vrot.lane.b32.xlu0 %v1331_v30, %s3217_s19  ;;  %v2745_v1 = vpop.f32.mrb[43].mxu0 }
 0x47d   : > { %v1336_v11 = vpop.f32.mrb[44].mxu0 }
 0x47e   : > { %2122 = vrot.lane.b32.xlu0 %v1336_v11, %s3217_s19  ;;  %v2748_v0 = vpop.f32.mrb[45].mxu0 }
 0x481   : > { %v1341_v5 = vpop.f32.mrb[46].mxu0 }
 0x482   : > { %2124 = vrot.lane.b32.xlu1 %v1341_v5, %s3217_s19  ;;  %v2751_v17 = vpop.f32.mrb[47].mxu0 }
 0x485   : > { %v1346_v9 = vpop.f32.mrb[48].mxu0 }
 0x486   : > { %2126 = vrot.lane.b32.xlu0 %v1346_v9, %s3217_s19  ;;  %v2754_v56 = vpop.f32.mrb[49].mxu0 }
 0x4bf   : > { %v1691_v45 = vpop.f32.mrb[50].mxu0 }
 0x4c0   : > { %2150 = vrot.lane.b32.xlu1 %v1691_v45, %s3218_s17  ;;  %v2806_v48 = vpop.f32.mrb[51].mxu0 }
 0x4c3   : > { %v1696_v53 = vpop.f32.mrb[52].mxu0 }
 0x4c4   : > { %2152 = vrot.lane.b32.xlu0 %v1696_v53, %s3218_s17  ;;  %v2809_v14 = vpop.f32.mrb[53].mxu0 }
 0x4c7   : > { %v1701_v23 = vpop.f32.mrb[54].mxu0 }
 0x4c8   : > { %2154 = vrot.lane.b32.xlu1 %v1701_v23, %s3218_s17  ;;  %v2812_v7 = vpop.f32.mrb[55].mxu0 }
 0x4cb   : > { %v1706_v21 = vpop.f32.mrb[56].mxu0 }
 0x4cc   : > { %2156 = vrot.lane.b32.xlu0 %v1706_v21, %s3218_s17  ;;  %v2815_v2 = vpop.f32.mrb[57].mxu0 }
 0x4cf   : > { %v1711_v26 = vpop.f32.mrb[58].mxu0 }
 0x4d0   : > { %2158 = vrot.lane.b32.xlu1 %v1711_v26, %s3218_s17  ;;  %v2818_v58 = vpop.f32.mrb[59].mxu0 }
 0x4d3   : > { %v1716_v32 = vpop.f32.mrb[60].mxu0 }
 0x4d4   : > { %2160 = vrot.lane.b32.xlu0 %v1716_v32, %s3218_s17  ;;  %v2821_v41 = vpop.f32.mrb[61].mxu0 }
 0x4d7   : > { %v1721_v8 = vpop.f32.mrb[62].mxu0 }
 0x4d8   : > { %2162 = vrot.lane.b32.xlu1 %v1721_v8, %s3218_s17  ;;  %v2824_v36 = vpop.f32.mrb[63].mxu0 }
 0x4e0   : > { %v2115_v18 = vpop.permute.xlu1 %2114 }
 0x4e1   : > { %2136 = vst.msk [vmem:[%s4018_s16] sm:$0xff] %vm2135_vm5, %v2115_v18 }
 0x4e4   : > { %v2117_v63 = vpop.permute.xlu0 %2116 }
 0x4e5   : > { %2137 = vst.msk [vmem:[%s4018_s16 + $0x8] sm:$0xff] %vm2135_vm5, %v2117_v63 }
 0x4e8   : > { %v2119_v57 = vpop.permute.xlu0 %2118 }
 0x4e9   : > { %2138 = vst.msk [vmem:[%s4018_s16 + $0x10] sm:$0xff] %vm2135_vm5, %v2119_v57 }
 0x4ec   : > { %v2121_v15 = vpop.permute.xlu0 %2120 }
 0x4ed   : > { %2139 = vst.msk [vmem:[%s4018_s16 + $0x18] sm:$0xff] %vm2135_vm5, %v2121_v15 }
 0x4f0   : > { %v2123_v20 = vpop.permute.xlu0 %2122 }
 0x4f1   : > { %2140 = vst.msk [vmem:[%s4018_s16 + $0x20] sm:$0xff] %vm2135_vm5, %v2123_v20 }
 0x4f4   : > { %v2125_v37 = vpop.permute.xlu1 %2124 }
 0x4f5   : > { %2141 = vst.msk [vmem:[%s4018_s16 + $0x28] sm:$0xff] %vm2135_vm5, %v2125_v37 }
 0x4f8   : > { %v2127_v61 = vpop.permute.xlu0 %2126 }
 0x4f9   : > { %2142 = vst.msk [vmem:[%s4018_s16 + $0x30] sm:$0xff] %vm2135_vm5, %v2127_v61 }
 0x50f   : > { %v2066_v40 = vpop.f32.mrb[64].mxu0 }
 0x510   : > { %2186 = vrot.lane.b32.xlu0 %v2066_v40, %s3219_s20  ;;  %v2876_v60 = vpop.f32.mrb[65].mxu0 }
 0x513   : > { %v2071_v19 = vpop.f32.mrb[66].mxu0 }
 0x514   : > { %2188 = vrot.lane.b32.xlu1 %v2071_v19, %s3219_s20  ;;  %v2879_v12 = vpop.f32.mrb[67].mxu0 }
 0x517   : > { %v2076_v62 = vpop.f32.mrb[68].mxu0 }
 0x518   : > { %2190 = vrot.lane.b32.xlu0 %v2076_v62, %s3219_s20  ;;  %v2882_v50 = vpop.f32.mrb[69].mxu0 }
 0x51b   : > { %v2081_v34 = vpop.f32.mrb[70].mxu0 }
 0x51c   : > { %2192 = vrot.lane.b32.xlu1 %v2081_v34, %s3219_s20  ;;  %v2885_v31 = vpop.f32.mrb[71].mxu0 }
 0x51f   : > { %v2086_v33 = vpop.f32.mrb[72].mxu0 }
 0x520   : > { %2194 = vrot.lane.b32.xlu0 %v2086_v33, %s3219_s20  ;;  %v2888_v42 = vpop.f32.mrb[73].mxu0 }
 0x523   : > { %v2091_v49 = vpop.f32.mrb[74].mxu0 }
 0x524   : > { %2196 = vrot.lane.b32.xlu1 %v2091_v49, %s3219_s20  ;;  %v2891_v38 = vpop.f32.mrb[75].mxu0 }
 0x527   : > { %v2096_v55 = vpop.f32.mrb[76].mxu0 }
 0x528   : > { %2198 = vrot.lane.b32.xlu0 %v2096_v55, %s3219_s20  ;;  %v2894_v39 = vpop.f32.mrb[77].mxu0 }
 0x532   : > { %v2151_v51 = vpop.permute.xlu1 %2150 }
 0x533   : > { %2172 = vst.msk [vmem:[%s4018_s16] sm:$0xff] %vm2171_vm6, %v2151_v51 }
 0x536   : > { %v2153_v59 = vpop.permute.xlu0 %2152 }
 0x537   : > { %2173 = vst.msk [vmem:[%s4018_s16 + $0x8] sm:$0xff] %vm2171_vm6, %v2153_v59 }
 0x53a   : > { %v2155_v24 = vpop.permute.xlu1 %2154 }
 0x53b   : > { %2174 = vst.msk [vmem:[%s4018_s16 + $0x10] sm:$0xff] %vm2171_vm6, %v2155_v24 }
 0x53e   : > { %v2157_v10 = vpop.permute.xlu0 %2156 }
 0x53f   : > { %2175 = vst.msk [vmem:[%s4018_s16 + $0x18] sm:$0xff] %vm2171_vm6, %v2157_v10 }
 0x542   : > { %v2159_v44 = vpop.permute.xlu1 %2158 }
 0x543   : > { %2176 = vst.msk [vmem:[%s4018_s16 + $0x20] sm:$0xff] %vm2171_vm6, %v2159_v44 }
 0x546   : > { %v2161_v22 = vpop.permute.xlu0 %2160 }
 0x547   : > { %2177 = vst.msk [vmem:[%s4018_s16 + $0x28] sm:$0xff] %vm2171_vm6, %v2161_v22 }
 0x54a   : > { %v2163_v54 = vpop.permute.xlu1 %2162 }
 0x54b   : > { %2178 = vst.msk [vmem:[%s4018_s16 + $0x30] sm:$0xff] %vm2171_vm6, %v2163_v54 }
 0x582   : > { %v2187_v6 = vpop.permute.xlu0 %2186 }
 0x583   : > { %2208 = vst.msk [vmem:[%s4018_s16] sm:$0xff] %vm2207_vm7, %v2187_v6 }
 0x586   : > { %v2189_v29 = vpop.permute.xlu1 %2188 }
 0x587   : > { %2209 = vst.msk [vmem:[%s4018_s16 + $0x8] sm:$0xff] %vm2207_vm7, %v2189_v29 }
 0x58a   : > { %v2191_v25 = vpop.permute.xlu0 %2190 }
 0x58b   : > { %2210 = vst.msk [vmem:[%s4018_s16 + $0x10] sm:$0xff] %vm2207_vm7, %v2191_v25 }
 0x58e   : > { %v2193_v28 = vpop.permute.xlu1 %2192 }
 0x58f   : > { %2211 = vst.msk [vmem:[%s4018_s16 + $0x18] sm:$0xff] %vm2207_vm7, %v2193_v28 }
 0x592   : > { %v2195_v13 = vpop.permute.xlu0 %2194 }
 0x593   : > { %2212 = vst.msk [vmem:[%s4018_s16 + $0x20] sm:$0xff] %vm2207_vm7, %v2195_v13 }
 0x596   : > { %v2197_v4 = vpop.permute.xlu1 %2196 }
 0x597   : > { %2213 = vst.msk [vmem:[%s4018_s16 + $0x28] sm:$0xff] %vm2207_vm7, %v2197_v4 }
 0x59a   : > { %v2199_v27 = vpop.permute.xlu0 %2198 }
 0x59b   : > { %2214 = vst.msk [vmem:[%s4018_s16 + $0x30] sm:$0xff] %vm2207_vm7, %v2199_v27 }
 0x59c PF: > { %s15_s18 = sadd.s32 1, %s3208_s18  }
 0x59d   : > { %p12_p4 = scmp.ge.s32.totalorder %s15_s18, 4  }
 0x59f   :  { %14 = sbr.rel (!%p12_p4) target bundleno = 1 (0x1), region = 76 }

</bundles_post_ra>
